<compile_context>
chip_gen: v5e
topology: v5e:2x2
jax: 0.10.0
libtpu: 0.0.40
codegen_flags: <defaults>
</compile_context>

<pallas_src>
import jax
import jax.numpy as jnp
from jax.experimental import pallas as pl
from jax.experimental.pallas import tpu as pltpu

N_FEATURES = 32
N_HIDDEN_LAYERS = 2
N_LINEAR_LN = 1 + N_HIDDEN_LAYERS   # Linear->LayerNorm->ReLU blocks
LN_EPS = 1e-5                       # torch.nn.LayerNorm default
TB_MAX = 8192                       # max batch tile (lane axis inside kernel)

# Packed vector-parameter table (32, 12), f32 columns:
#   col 3*l+0 = bias_l, 3*l+1 = ln_gamma_l, 3*l+2 = ln_beta_l   (l = 0..2)
#   col 9     = final Linear(32,1) weight
#   col 10    = final Linear bias (row 0)
#   col 11    = padding
VEC_COLS = 12


def mlp_kernel(x_ref, w_ref, vec_ref, out_ref):
    # One-time reorientation: (TB, 32) -> (32, TB). Batch lands on the
    # 128-lane axis; XLU transpose cost is tiny vs. the old wrapper-side
    # HBM round trip.
    h = x_ref[...].T                                         # (32, TB) f32

    for l in range(N_LINEAR_LN):                             # static 3-layer unroll
        w = w_ref[l]                                         # (32, 32) bf16, resident
        b = vec_ref[:, 3 * l + 0:3 * l + 1]                  # (32, 1) f32
        g = vec_ref[:, 3 * l + 1:3 * l + 2]
        beta = vec_ref[:, 3 * l + 2:3 * l + 3]

        # MXU: bf16 operands, f32 accumulate, N = TB keeps the array busy.
        z = jnp.dot(w, h.astype(jnp.bfloat16),
                    preferred_element_type=jnp.float32) + b  # (32, TB)

        # Single-pass LayerNorm statistics over the feature (sublane) axis.
        mu = jnp.mean(z, axis=0, keepdims=True)                              # (1, TB)
        var = jnp.maximum(jnp.mean(z * z, axis=0, keepdims=True) - mu * mu, 0.0)
        z = (z - mu) * jax.lax.rsqrt(var + LN_EPS) * g + beta
        h = jnp.maximum(z, 0.0)                                              # ReLU (f32)

    # Final Linear(32, 1): VPU broadcast-multiply + feature(sublane) reduce;
    # an N=1 MXU matmul would be wasted.
    w3 = vec_ref[:, 9:10]                                    # (32, 1) f32
    b3 = vec_ref[0:1, 10:11]                                 # (1, 1) f32
    out = jnp.sum(h * w3, axis=0, keepdims=True) + b3        # (1, TB), lane-dense
    out_ref[...] = out.astype(out_ref.dtype)


def _round_up(x, m):
    return ((x + m - 1) // m) * m


def pack_params(params):
    """Coalesce the 14 tiny parameters into 2 VMEM-resident arrays."""
    w_stack = jnp.stack([w for (w, _, _, _) in params["hidden"]]).astype(jnp.bfloat16)
    cols = []
    for (_, b, g, be) in params["hidden"]:
        cols.extend([b, g, be])                                   # (32, 1) each
    w_f, b_f = params["final"]
    cols.append(w_f)                                              # col 9
    cols.append(jnp.broadcast_to(b_f, (N_FEATURES, 1)))           # col 10
    cols.append(jnp.zeros((N_FEATURES, 1), jnp.float32))          # col 11 pad
    vec = jnp.concatenate(cols, axis=1).astype(jnp.float32)       # (32, 12)
    return w_stack, vec


@jax.jit
def mlp_forward(x, w_stack, vec):
    batch = x.shape[0]
    # Keep >= 2 grid blocks when the batch allows it (v7x megacore split),
    # tile multiple of 512 (sublane- and lane-friendly).
    tb = min(TB_MAX, _round_up(max(pl.cdiv(batch, 2), 1), 512))
    n_blocks = pl.cdiv(batch, tb)

    x = x.astype(jnp.float32)   # no transpose / no pad in the wrapper

    flops = batch * (N_LINEAR_LN * 2 * N_FEATURES * N_FEATURES
                     + N_LINEAR_LN * 8 * N_FEATURES
                     + 2 * N_FEATURES)
    bytes_accessed = (batch * (N_FEATURES + 1) * 4
                      + int(w_stack.size) * 2 + int(vec.size) * 4)

    out = pl.pallas_call(
        mlp_kernel,
        out_shape=jax.ShapeDtypeStruct((1, batch), jnp.float32),
        grid=(n_blocks,),
        in_specs=[
            pl.BlockSpec((tb, N_FEATURES), lambda i: (i, 0)),      # x tile
            pl.BlockSpec(w_stack.shape, lambda i: (0, 0, 0)),      # resident weights
            pl.BlockSpec(vec.shape, lambda i: (0, 0)),             # resident vec params
        ],
        out_specs=pl.BlockSpec((1, tb), lambda i: (0, i)),
        compiler_params=pltpu.CompilerParams(
            dimension_semantics=("parallel",),        # megacore split on v7x
            vmem_limit_bytes=32 << 20),               # explicit budget (v5e/v7x safe)
        cost_estimate=pl.CostEstimate(
            flops=int(flops),
            transcendentals=int(batch * N_LINEAR_LN),
            bytes_accessed=int(bytes_accessed)),
    )(x, w_stack, vec)

    return out[0].reshape(batch, 1)


def init_params(key):
    """Deterministic init mirroring torch.nn.Linear defaults U(-1/sqrt(fan_in), +)."""
    params = {"hidden": [], "final": None}
    in_dim = N_FEATURES
    for _ in range(N_LINEAR_LN):
        out_dim = N_FEATURES
        key, kw, kb = jax.random.split(key, 3)
        bound = 1.0 / (in_dim ** 0.5)
        w = jax.random.uniform(kw, (out_dim, in_dim), jnp.float32, -bound, bound)
        b = jax.random.uniform(kb, (out_dim, 1), jnp.float32, -bound, bound)
        g = jnp.ones((out_dim, 1), jnp.float32)    # LayerNorm weight
        be = jnp.zeros((out_dim, 1), jnp.float32)  # LayerNorm bias
        params["hidden"].append((w, b, g, be))
        in_dim = out_dim
    key, kw, kb = jax.random.split(key, 3)
    bound = 1.0 / (in_dim ** 0.5)
    w_f = jax.random.uniform(kw, (in_dim, 1), jnp.float32, -bound, bound)   # (32, 1)
    b_f = jax.random.uniform(kb, (1, 1), jnp.float32, -bound, bound)
    params["final"] = (w_f, b_f)
    return params


def reference_forward(x, params):
    """Pure-JAX f32 reference in the standard (batch, features) layout."""
    h = x.astype(jnp.float32)
    for (w, b, g, be) in params["hidden"]:
        h = h @ w.T + b.T
        mu = jnp.mean(h, axis=-1, keepdims=True)
        var = jnp.mean((h - mu) ** 2, axis=-1, keepdims=True)
        h = (h - mu) * jax.lax.rsqrt(var + LN_EPS) * g.T + be.T
        h = jnp.maximum(h, 0.0)
    w_f, b_f = params["final"]
    return h @ w_f + b_f


if __name__ == "__main__":
    key = jax.random.PRNGKey(0)
    key, kx = jax.random.split(key)
    batch = 8
    x = jax.random.normal(kx, (batch, N_FEATURES), jnp.float32)

    params = init_params(key)
    w_stack, vec = pack_params(params)

    out = jax.block_until_ready(mlp_forward(x, w_stack, vec))
    ref = reference_forward(x, params)
    assert out.shape == (batch, 1), out.shape
    # bf16 MXU operands (f32 accumulate) -> looser tolerance vs. pure-f32 reference.
    assert jnp.allclose(out, ref, atol=2e-2, rtol=2e-2), (out, ref)

    # Exercise multi-block + ragged-last-block path (no wrapper-side padding).
    key, kx2 = jax.random.split(key)
    batch2 = 1000
    x2 = jax.random.normal(kx2, (batch2, N_FEATURES), jnp.float32)
    out2 = jax.block_until_ready(mlp_forward(x2, w_stack, vec))
    ref2 = reference_forward(x2, params)
    assert out2.shape == (batch2, 1), out2.shape
    assert jnp.allclose(out2, ref2, atol=2e-2, rtol=2e-2)

    print("KERNEL_OK")
</pallas_src>

<mosaic_0001>
module attributes {stable_mosaic.version = 11 : i64} {
  func.func @mlp_kernel(%arg0: i32, %arg1: memref<512x32xf32, #tpu.memory_space<vmem>>, %arg2: memref<3x32x32xbf16, #tpu.memory_space<vmem>>, %arg3: memref<32x12xf32, #tpu.memory_space<vmem>>, %arg4: memref<1x512xf32, #tpu.memory_space<vmem>>) attributes {dimension_semantics = [#tpu.dimension_semantics<parallel>], iteration_bounds = array<i64: 1>, scalar_prefetch = 0 : i64, scratch_operands = 0 : i64, tpu.core_type = #tpu.core_type<tc>, window_params = [{transform_indices = @transform_0, window_bounds = array<i64: 512, 32>}, {pipeline_mode = #tpu.pipeline_mode<synchronous>, transform_indices = @transform_1, window_bounds = array<i64: 3, 32, 32>}, {pipeline_mode = #tpu.pipeline_mode<synchronous>, transform_indices = @transform_2, window_bounds = array<i64: 32, 12>}, {transform_indices = @transform_3, window_bounds = array<i64: 1, 512>}]} {
    %c0 = arith.constant 0 : index
    %c0_0 = arith.constant 0 : index
    %0 = vector.load %arg1[%c0, %c0_0] : memref<512x32xf32, #tpu.memory_space<vmem>>, vector<512x32xf32>
    %1 = tpu.transpose %0, [1, 0] : vector<512x32xf32> -> vector<32x512xf32>
    %c0_1 = arith.constant 0 : index
    %c0_2 = arith.constant 0 : index
    %c0_3 = arith.constant 0 : index
    %2 = vector.load %arg2[%c0_1, %c0_2, %c0_3] : memref<3x32x32xbf16, #tpu.memory_space<vmem>>, vector<1x32x32xbf16>
    %3 = vector.shape_cast %2 : vector<1x32x32xbf16> to vector<32x32xbf16>
    %c0_4 = arith.constant 0 : index
    %c0_5 = arith.constant 0 : index
    %4 = vector.load %arg3[%c0_4, %c0_5] : memref<32x12xf32, #tpu.memory_space<vmem>>, vector<32x1xf32>
    %c0_6 = arith.constant 0 : index
    %c1 = arith.constant 1 : index
    %5 = vector.load %arg3[%c0_6, %c1] : memref<32x12xf32, #tpu.memory_space<vmem>>, vector<32x1xf32>
    %c0_7 = arith.constant 0 : index
    %c2 = arith.constant 2 : index
    %6 = vector.load %arg3[%c0_7, %c2] : memref<32x12xf32, #tpu.memory_space<vmem>>, vector<32x1xf32>
    %7 = arith.truncf %1 : vector<32x512xf32> to vector<32x512xbf16>
    %cst = arith.constant dense<0.000000e+00> : vector<32x512xf32>
    %8 = tpu.matmul %3, %7, %cst {dimension_numbers = #tpu.dot_dimension_numbers<[1], [0], [0], [1], [0, 0, 1, 1], [], []>} : vector<32x32xbf16>, vector<32x512xbf16>, vector<32x512xf32> -> vector<32x512xf32>
    %9 = vector.broadcast %4 : vector<32x1xf32> to vector<32x512xf32>
    %10 = arith.addf %8, %9 : vector<32x512xf32>
    %cst_8 = arith.constant dense<0.000000e+00> : vector<512xf32>
    %11 = vector.multi_reduction <add>, %10, %cst_8 [0] : vector<32x512xf32> to vector<512xf32>
    %12 = vector.shape_cast %11 : vector<512xf32> to vector<1x512xf32>
    %cst_9 = arith.constant 3.200000e+01 : f32
    %13 = vector.broadcast %cst_9 : f32 to vector<1x512xf32>
    %14 = arith.divf %12, %13 : vector<1x512xf32>
    %15 = arith.mulf %10, %10 : vector<32x512xf32>
    %cst_10 = arith.constant dense<0.000000e+00> : vector<512xf32>
    %16 = vector.multi_reduction <add>, %15, %cst_10 [0] : vector<32x512xf32> to vector<512xf32>
    %17 = vector.shape_cast %16 : vector<512xf32> to vector<1x512xf32>
    %cst_11 = arith.constant 3.200000e+01 : f32
    %18 = vector.broadcast %cst_11 : f32 to vector<1x512xf32>
    %19 = arith.divf %17, %18 : vector<1x512xf32>
    %20 = arith.mulf %14, %14 : vector<1x512xf32>
    %21 = arith.subf %19, %20 : vector<1x512xf32>
    %cst_12 = arith.constant 0.000000e+00 : f32
    %22 = vector.broadcast %cst_12 : f32 to vector<1x512xf32>
    %23 = arith.maximumf %21, %22 : vector<1x512xf32>
    %24 = vector.broadcast %14 : vector<1x512xf32> to vector<32x512xf32>
    %25 = arith.subf %10, %24 : vector<32x512xf32>
    %cst_13 = arith.constant 9.99999974E-6 : f32
    %26 = vector.broadcast %cst_13 : f32 to vector<1x512xf32>
    %27 = arith.addf %23, %26 : vector<1x512xf32>
    %28 = math.rsqrt %27 : vector<1x512xf32>
    %29 = vector.broadcast %28 : vector<1x512xf32> to vector<32x512xf32>
    %30 = arith.mulf %25, %29 : vector<32x512xf32>
    %31 = vector.broadcast %5 : vector<32x1xf32> to vector<32x512xf32>
    %32 = arith.mulf %30, %31 : vector<32x512xf32>
    %33 = vector.broadcast %6 : vector<32x1xf32> to vector<32x512xf32>
    %34 = arith.addf %32, %33 : vector<32x512xf32>
    %cst_14 = arith.constant 0.000000e+00 : f32
    %35 = vector.broadcast %cst_14 : f32 to vector<32x512xf32>
    %36 = arith.maximumf %34, %35 : vector<32x512xf32>
    %c1_15 = arith.constant 1 : index
    %c0_16 = arith.constant 0 : index
    %c0_17 = arith.constant 0 : index
    %37 = vector.load %arg2[%c1_15, %c0_16, %c0_17] : memref<3x32x32xbf16, #tpu.memory_space<vmem>>, vector<1x32x32xbf16>
    %38 = vector.shape_cast %37 : vector<1x32x32xbf16> to vector<32x32xbf16>
    %c0_18 = arith.constant 0 : index
    %c3 = arith.constant 3 : index
    %39 = vector.load %arg3[%c0_18, %c3] : memref<32x12xf32, #tpu.memory_space<vmem>>, vector<32x1xf32>
    %c0_19 = arith.constant 0 : index
    %c4 = arith.constant 4 : index
    %40 = vector.load %arg3[%c0_19, %c4] : memref<32x12xf32, #tpu.memory_space<vmem>>, vector<32x1xf32>
    %c0_20 = arith.constant 0 : index
    %c5 = arith.constant 5 : index
    %41 = vector.load %arg3[%c0_20, %c5] : memref<32x12xf32, #tpu.memory_space<vmem>>, vector<32x1xf32>
    %42 = arith.truncf %36 : vector<32x512xf32> to vector<32x512xbf16>
    %cst_21 = arith.constant dense<0.000000e+00> : vector<32x512xf32>
    %43 = tpu.matmul %38, %42, %cst_21 {dimension_numbers = #tpu.dot_dimension_numbers<[1], [0], [0], [1], [0, 0, 1, 1], [], []>} : vector<32x32xbf16>, vector<32x512xbf16>, vector<32x512xf32> -> vector<32x512xf32>
    %44 = vector.broadcast %39 : vector<32x1xf32> to vector<32x512xf32>
    %45 = arith.addf %43, %44 : vector<32x512xf32>
    %cst_22 = arith.constant dense<0.000000e+00> : vector<512xf32>
    %46 = vector.multi_reduction <add>, %45, %cst_22 [0] : vector<32x512xf32> to vector<512xf32>
    %47 = vector.shape_cast %46 : vector<512xf32> to vector<1x512xf32>
    %cst_23 = arith.constant 3.200000e+01 : f32
    %48 = vector.broadcast %cst_23 : f32 to vector<1x512xf32>
    %49 = arith.divf %47, %48 : vector<1x512xf32>
    %50 = arith.mulf %45, %45 : vector<32x512xf32>
    %cst_24 = arith.constant dense<0.000000e+00> : vector<512xf32>
    %51 = vector.multi_reduction <add>, %50, %cst_24 [0] : vector<32x512xf32> to vector<512xf32>
    %52 = vector.shape_cast %51 : vector<512xf32> to vector<1x512xf32>
    %cst_25 = arith.constant 3.200000e+01 : f32
    %53 = vector.broadcast %cst_25 : f32 to vector<1x512xf32>
    %54 = arith.divf %52, %53 : vector<1x512xf32>
    %55 = arith.mulf %49, %49 : vector<1x512xf32>
    %56 = arith.subf %54, %55 : vector<1x512xf32>
    %cst_26 = arith.constant 0.000000e+00 : f32
    %57 = vector.broadcast %cst_26 : f32 to vector<1x512xf32>
    %58 = arith.maximumf %56, %57 : vector<1x512xf32>
    %59 = vector.broadcast %49 : vector<1x512xf32> to vector<32x512xf32>
    %60 = arith.subf %45, %59 : vector<32x512xf32>
    %cst_27 = arith.constant 9.99999974E-6 : f32
    %61 = vector.broadcast %cst_27 : f32 to vector<1x512xf32>
    %62 = arith.addf %58, %61 : vector<1x512xf32>
    %63 = math.rsqrt %62 : vector<1x512xf32>
    %64 = vector.broadcast %63 : vector<1x512xf32> to vector<32x512xf32>
    %65 = arith.mulf %60, %64 : vector<32x512xf32>
    %66 = vector.broadcast %40 : vector<32x1xf32> to vector<32x512xf32>
    %67 = arith.mulf %65, %66 : vector<32x512xf32>
    %68 = vector.broadcast %41 : vector<32x1xf32> to vector<32x512xf32>
    %69 = arith.addf %67, %68 : vector<32x512xf32>
    %cst_28 = arith.constant 0.000000e+00 : f32
    %70 = vector.broadcast %cst_28 : f32 to vector<32x512xf32>
    %71 = arith.maximumf %69, %70 : vector<32x512xf32>
    %c2_29 = arith.constant 2 : index
    %c0_30 = arith.constant 0 : index
    %c0_31 = arith.constant 0 : index
    %72 = vector.load %arg2[%c2_29, %c0_30, %c0_31] : memref<3x32x32xbf16, #tpu.memory_space<vmem>>, vector<1x32x32xbf16>
    %73 = vector.shape_cast %72 : vector<1x32x32xbf16> to vector<32x32xbf16>
    %c0_32 = arith.constant 0 : index
    %c6 = arith.constant 6 : index
    %74 = vector.load %arg3[%c0_32, %c6] : memref<32x12xf32, #tpu.memory_space<vmem>>, vector<32x1xf32>
    %c0_33 = arith.constant 0 : index
    %c7 = arith.constant 7 : index
    %75 = vector.load %arg3[%c0_33, %c7] : memref<32x12xf32, #tpu.memory_space<vmem>>, vector<32x1xf32>
    %c0_34 = arith.constant 0 : index
    %c8 = arith.constant 8 : index
    %76 = vector.load %arg3[%c0_34, %c8] : memref<32x12xf32, #tpu.memory_space<vmem>>, vector<32x1xf32>
    %77 = arith.truncf %71 : vector<32x512xf32> to vector<32x512xbf16>
    %cst_35 = arith.constant dense<0.000000e+00> : vector<32x512xf32>
    %78 = tpu.matmul %73, %77, %cst_35 {dimension_numbers = #tpu.dot_dimension_numbers<[1], [0], [0], [1], [0, 0, 1, 1], [], []>} : vector<32x32xbf16>, vector<32x512xbf16>, vector<32x512xf32> -> vector<32x512xf32>
    %79 = vector.broadcast %74 : vector<32x1xf32> to vector<32x512xf32>
    %80 = arith.addf %78, %79 : vector<32x512xf32>
    %cst_36 = arith.constant dense<0.000000e+00> : vector<512xf32>
    %81 = vector.multi_reduction <add>, %80, %cst_36 [0] : vector<32x512xf32> to vector<512xf32>
    %82 = vector.shape_cast %81 : vector<512xf32> to vector<1x512xf32>
    %cst_37 = arith.constant 3.200000e+01 : f32
    %83 = vector.broadcast %cst_37 : f32 to vector<1x512xf32>
    %84 = arith.divf %82, %83 : vector<1x512xf32>
    %85 = arith.mulf %80, %80 : vector<32x512xf32>
    %cst_38 = arith.constant dense<0.000000e+00> : vector<512xf32>
    %86 = vector.multi_reduction <add>, %85, %cst_38 [0] : vector<32x512xf32> to vector<512xf32>
    %87 = vector.shape_cast %86 : vector<512xf32> to vector<1x512xf32>
    %cst_39 = arith.constant 3.200000e+01 : f32
    %88 = vector.broadcast %cst_39 : f32 to vector<1x512xf32>
    %89 = arith.divf %87, %88 : vector<1x512xf32>
    %90 = arith.mulf %84, %84 : vector<1x512xf32>
    %91 = arith.subf %89, %90 : vector<1x512xf32>
    %cst_40 = arith.constant 0.000000e+00 : f32
    %92 = vector.broadcast %cst_40 : f32 to vector<1x512xf32>
    %93 = arith.maximumf %91, %92 : vector<1x512xf32>
    %94 = vector.broadcast %84 : vector<1x512xf32> to vector<32x512xf32>
    %95 = arith.subf %80, %94 : vector<32x512xf32>
    %cst_41 = arith.constant 9.99999974E-6 : f32
    %96 = vector.broadcast %cst_41 : f32 to vector<1x512xf32>
    %97 = arith.addf %93, %96 : vector<1x512xf32>
    %98 = math.rsqrt %97 : vector<1x512xf32>
    %99 = vector.broadcast %98 : vector<1x512xf32> to vector<32x512xf32>
    %100 = arith.mulf %95, %99 : vector<32x512xf32>
    %101 = vector.broadcast %75 : vector<32x1xf32> to vector<32x512xf32>
    %102 = arith.mulf %100, %101 : vector<32x512xf32>
    %103 = vector.broadcast %76 : vector<32x1xf32> to vector<32x512xf32>
    %104 = arith.addf %102, %103 : vector<32x512xf32>
    %cst_42 = arith.constant 0.000000e+00 : f32
    %105 = vector.broadcast %cst_42 : f32 to vector<32x512xf32>
    %106 = arith.maximumf %104, %105 : vector<32x512xf32>
    %c0_43 = arith.constant 0 : index
    %c9 = arith.constant 9 : index
    %107 = vector.load %arg3[%c0_43, %c9] : memref<32x12xf32, #tpu.memory_space<vmem>>, vector<32x1xf32>
    %c0_44 = arith.constant 0 : index
    %c10 = arith.constant 10 : index
    %108 = vector.load %arg3[%c0_44, %c10] : memref<32x12xf32, #tpu.memory_space<vmem>>, vector<1x1xf32>
    %109 = vector.broadcast %107 : vector<32x1xf32> to vector<32x512xf32>
    %110 = arith.mulf %106, %109 : vector<32x512xf32>
    %cst_45 = arith.constant dense<0.000000e+00> : vector<512xf32>
    %111 = vector.multi_reduction <add>, %110, %cst_45 [0] : vector<32x512xf32> to vector<512xf32>
    %112 = vector.shape_cast %111 : vector<512xf32> to vector<1x512xf32>
    %113 = vector.broadcast %108 : vector<1x1xf32> to vector<1x512xf32>
    %114 = arith.addf %112, %113 : vector<1x512xf32>
    %c0_46 = arith.constant 0 : index
    %c0_47 = arith.constant 0 : index
    %115 = vector.load %arg4[%c0_46, %c0_47] : memref<1x512xf32, #tpu.memory_space<vmem>>, vector<1x512xf32>
    tpu.vector_store %arg4[%c0_46, %c0_47], %114 {strides = array<i32>} : memref<1x512xf32, #tpu.memory_space<vmem>>, vector<1x512xf32>,
    return
  }
  func.func @transform_0(%arg0: i32) -> (i32, i32) {
    %c0_i32 = arith.constant 0 : i32
    %c0_i32_0 = arith.constant 0 : i32
    return %arg0, %c0_i32 : i32, i32
  }
  func.func @transform_1(%arg0: i32) -> (i32, i32, i32) {
    %c0_i32 = arith.constant 0 : i32
    %c0_i32_0 = arith.constant 0 : i32
    %c0_i32_1 = arith.constant 0 : i32
    %c0_i32_2 = arith.constant 0 : i32
    return %c0_i32, %c0_i32_0, %c0_i32_1 : i32, i32, i32
  }
  func.func @transform_2(%arg0: i32) -> (i32, i32) {
    %c0_i32 = arith.constant 0 : i32
    %c0_i32_0 = arith.constant 0 : i32
    %c0_i32_1 = arith.constant 0 : i32
    return %c0_i32, %c0_i32_0 : i32, i32
  }
  func.func @transform_3(%arg0: i32) -> (i32, i32) {
    %c0_i32 = arith.constant 0 : i32
    %c0_i32_0 = arith.constant 0 : i32
    return %c0_i32, %arg0 : i32, i32
  }
}

</mosaic_0001>

<bundles_post_ra>
// kernel: mlp_forward.1
= control target key start
LH: loop header
LB: loop body
LE: loop exit
PB: predicated region body
PF: predicated region fallthrough
CT: control target
= control target key end

     0   :  { %8 = vsyncpa [#allocation3], 0  ;;  %s2600_s0 = inlined_call_operand.hbm [shape: f32[8,32], index: 0, kind: input, shape index: {}]   ;;  %s2601_s1 = inlined_call_operand.vmem [shape: bf16[3,32,32], index: 1, kind: input, shape index: {}]   ;;  %s2602_s2 = inlined_call_operand.vmem [shape: f32[32,12], index: 2, kind: input, shape index: {}]   ;;  %s2603_s3 = inlined_call_operand.hbm [shape: f32[1,8], index: 3, kind: output, shape index: {}]  }
   0x1   :  { %9 = vsyncpa [#allocation4], 0 }
   0x2   :  { %13 = vsyncadd [#allocation3], 8064  ;;  %s14_s14 = sshll.u32 %s2600_s0, 4  ;;  %s1793_s15 = smov [#allocation2]   ;;  %s15_s14 = int_to_ptr.hbm [resolvable:$true] %s14_s14 }
   0x3   :  { %s16_s16 = sshll.u32 %s1793_s15, 4  ;;  %s1794_s17 = smov 128   ;;  %s17_s16 = int_to_ptr.vmem [resolvable:$true] %s16_s16 }
   0x4   :  { %s1795_s18 = smov 8  }
   0x5   :  { %22 = dma.hbm_to_vmem [thread:$0]  %s15_s14, 128, %s17_s16, [#allocation3], %s1794_s17, %s1794_s17, %s1795_s18  }
   0x6   :  { %1789 = dma.done.wait [#allocation3], 8192  }
   0x7   :  { %1790 = vsyncadd [#allocation3], 4294959104  ;;  %v64_v0 = vld [vmem:[#allocation2 + $0x100] sm:$0xff]  ;;  %v65_v6 = vld [vmem:[#allocation2 + $0x108] sm:$0xff]  ;;  %vm270_vm0 = vcmask 261120  }
   0x8   :  { %v80_v1 = vld [vmem:[#allocation2 + $0x180] sm:$0xff]  ;;  %v81_v7 = vld [vmem:[#allocation2 + $0x188] sm:$0xff]  ;;  %v66_v12 = vld [vmem:[#allocation2 + $0x110] sm:$0xff] }
   0x9   :  { %v32_v2 = vld [vmem:[#allocation2] sm:$0xff]  ;;  %v1586_v3 = vpack.i.bf16 %v80_v1, %v64_v0  ;;  %v33_v8 = vld [vmem:[#allocation2 + $0x8] sm:$0xff]  ;;  %v1588_v10 = vpack.i.bf16 %v81_v7, %v65_v6  ;;  %v82_v13 = vld [vmem:[#allocation2 + $0x190] sm:$0xff] }
   0xa   :  { %v48_v4 = vld [vmem:[#allocation2 + $0x80] sm:$0xff]  ;;  %v49_v9 = vld [vmem:[#allocation2 + $0x88] sm:$0xff]  ;;  %v34_v14 = vld [vmem:[#allocation2 + $0x10] sm:$0xff]  ;;  %v1590_v16 = vpack.i.bf16 %v82_v13, %v66_v12 }
   0xb   :  { %v1638_v5 = vpack.i.bf16 %v32_v2, %v48_v4  ;;  %1587 = vxpose.xlu0.b32.start [1/16] (narrow) %v1586_v3, 32  ;;  %v1640_v11 = vpack.i.bf16 %v33_v8, %v49_v9  ;;  %v50_v15 = vld [vmem:[#allocation2 + $0x90] sm:$0xff]  ;;  %v67_v18 = vld [vmem:[#allocation2 + $0x118] sm:$0xff]  ;;  %v68_v24 = vld [vmem:[#allocation2 + $0x120] sm:$0xff] }
   0xc   :  { %v1642_v17 = vpack.i.bf16 %v34_v14, %v50_v15  ;;  %v83_v19 = vld [vmem:[#allocation2 + $0x198] sm:$0xff]  ;;  %v84_v25 = vld [vmem:[#allocation2 + $0x1a0] sm:$0xff]  ;;  %v69_v30 = vld [vmem:[#allocation2 + $0x128] sm:$0xff] }
   0xd   :  { %1639 = vxpose.xlu1.b32.start [1/16] (narrow) %v1638_v5, 32  ;;  %v35_v20 = vld [vmem:[#allocation2 + $0x18] sm:$0xff]  ;;  %v1592_v22 = vpack.i.bf16 %v83_v19, %v67_v18  ;;  %v36_v26 = vld [vmem:[#allocation2 + $0x20] sm:$0xff]  ;;  %v1594_v28 = vpack.i.bf16 %v84_v25, %v68_v24  ;;  %v85_v31 = vld [vmem:[#allocation2 + $0x1a8] sm:$0xff] }
   0xe   :  { %v51_v21 = vld [vmem:[#allocation2 + $0x98] sm:$0xff]  ;;  %v52_v27 = vld [vmem:[#allocation2 + $0xa0] sm:$0xff]  ;;  %v37_v32 = vld [vmem:[#allocation2 + $0x28] sm:$0xff]  ;;  %v1596_v34 = vpack.i.bf16 %v85_v31, %v69_v30 }
   0xf   :  { %v1644_v23 = vpack.i.bf16 %v35_v20, %v51_v21  ;;  %v1646_v29 = vpack.i.bf16 %v36_v26, %v52_v27  ;;  %v53_v33 = vld [vmem:[#allocation2 + $0xa8] sm:$0xff]  ;;  %v70_v36 = vld [vmem:[#allocation2 + $0x130] sm:$0xff]  ;;  %v71_v42 = vld [vmem:[#allocation2 + $0x138] sm:$0xff] }
  0x10   :  { %v1648_v35 = vpack.i.bf16 %v37_v32, %v53_v33  ;;  %v86_v37 = vld [vmem:[#allocation2 + $0x1b0] sm:$0xff]  ;;  %v87_v43 = vld [vmem:[#allocation2 + $0x1b8] sm:$0xff]  ;;  %v72_v48 = vld [vmem:[#allocation2 + $0x140] sm:$0xff] }
  0x11   :  { %v38_v38 = vld [vmem:[#allocation2 + $0x30] sm:$0xff]  ;;  %v1598_v40 = vpack.i.bf16 %v86_v37, %v70_v36  ;;  %v39_v44 = vld [vmem:[#allocation2 + $0x38] sm:$0xff]  ;;  %v1600_v46 = vpack.i.bf16 %v87_v43, %v71_v42  ;;  %v88_v49 = vld [vmem:[#allocation2 + $0x1c0] sm:$0xff] }
  0x12   :  { %v54_v39 = vld [vmem:[#allocation2 + $0xb0] sm:$0xff]  ;;  %v55_v45 = vld [vmem:[#allocation2 + $0xb8] sm:$0xff]  ;;  %v40_v50 = vld [vmem:[#allocation2 + $0x40] sm:$0xff]  ;;  %v1602_v52 = vpack.i.bf16 %v88_v49, %v72_v48 }
  0x13   :  { %1589 = vxpose.xlu0.b32.cont [2/16] (narrow) %v1588_v10, 32  ;;  %v1650_v41 = vpack.i.bf16 %v38_v38, %v54_v39  ;;  %v1652_v47 = vpack.i.bf16 %v39_v44, %v55_v45  ;;  %v56_v51 = vld [vmem:[#allocation2 + $0xc0] sm:$0xff]  ;;  %v73_v54 = vld [vmem:[#allocation2 + $0x148] sm:$0xff]  ;;  %v74_v60 = vld [vmem:[#allocation2 + $0x150] sm:$0xff] }
  0x14   :  { %v1654_v53 = vpack.i.bf16 %v40_v50, %v56_v51  ;;  %v89_v55 = vld [vmem:[#allocation2 + $0x1c8] sm:$0xff]  ;;  %v90_v61 = vld [vmem:[#allocation2 + $0x1d0] sm:$0xff]  ;;  %v75_v2 = vld [vmem:[#allocation2 + $0x158] sm:$0xff] }
  0x15   :  { %1641 = vxpose.xlu1.b32.cont [2/16] (narrow) %v1640_v11, 32  ;;  %v41_v56 = vld [vmem:[#allocation2 + $0x48] sm:$0xff]  ;;  %v1604_v58 = vpack.i.bf16 %v89_v55, %v73_v54  ;;  %v42_v62 = vld [vmem:[#allocation2 + $0x50] sm:$0xff]  ;;  %v1606_v0 = vpack.i.bf16 %v90_v61, %v74_v60  ;;  %v91_v3 = vld [vmem:[#allocation2 + $0x1d8] sm:$0xff] }
  0x16   :  { %v57_v57 = vld [vmem:[#allocation2 + $0xc8] sm:$0xff]  ;;  %v58_v63 = vld [vmem:[#allocation2 + $0xd0] sm:$0xff]  ;;  %v43_v4 = vld [vmem:[#allocation2 + $0x58] sm:$0xff]  ;;  %v1608_v6 = vpack.i.bf16 %v91_v3, %v75_v2 }
  0x17   :  { %v1656_v59 = vpack.i.bf16 %v41_v56, %v57_v57  ;;  %v1658_v1 = vpack.i.bf16 %v42_v62, %v58_v63  ;;  %v59_v5 = vld [vmem:[#allocation2 + $0xd8] sm:$0xff]  ;;  %v76_v8 = vld [vmem:[#allocation2 + $0x160] sm:$0xff]  ;;  %v77_v14 = vld [vmem:[#allocation2 + $0x168] sm:$0xff] }
  0x18   :  { %v1660_v7 = vpack.i.bf16 %v43_v4, %v59_v5  ;;  %v92_v9 = vld [vmem:[#allocation2 + $0x1e0] sm:$0xff]  ;;  %v93_v15 = vld [vmem:[#allocation2 + $0x1e8] sm:$0xff]  ;;  %v78_v20 = vld [vmem:[#allocation2 + $0x170] sm:$0xff] }
  0x19   :  { %v44_v10 = vld [vmem:[#allocation2 + $0x60] sm:$0xff]  ;;  %v1610_v12 = vpack.i.bf16 %v92_v9, %v76_v8  ;;  %v1612_v18 = vpack.i.bf16 %v93_v15, %v77_v14  ;;  %v94_v21 = vld [vmem:[#allocation2 + $0x1f0] sm:$0xff]  ;;  %v79_v26 = vld [vmem:[#allocation2 + $0x178] sm:$0xff]  ;;  %v1798_v8 = vmov 2  }
  0x1a   :  { %v60_v11 = vld [vmem:[#allocation2 + $0xe0] sm:$0xff]  ;;  %v1614_v24 = vpack.i.bf16 %v94_v21, %v78_v20  ;;  %v95_v27 = vld [vmem:[#allocation2 + $0x1f8] sm:$0xff]  ;;  %v1841_v38 = vld [vmem:[%s2602_s2 + $0x8] sm:$0xff] }
  0x1b   :  { %1591 = vxpose.xlu0.b32.cont [3/16] (narrow) %v1590_v16, 32  ;;  %v1662_v13 = vpack.i.bf16 %v44_v10, %v60_v11  ;;  %v45_v16 = vld [vmem:[#allocation2 + $0x68] sm:$0xff]  ;;  %v1616_v30 = vpack.i.bf16 %v95_v27, %v79_v26  ;;  %v1853_v62 = vld [vmem:[%s2602_s2 + $0x18] sm:$0xff]  ;;  %v1564_v5 = vld [vmem:[%s2601_s1] sm:$0xff] }
  0x1d   :  { %1643 = vxpose.xlu1.b32.cont [3/16] (narrow) %v1642_v17, 32  ;;  %v61_v17 = vld [vmem:[#allocation2 + $0xe8] sm:$0xff] }
  0x1e   :  { %v1664_v19 = vpack.i.bf16 %v45_v16, %v61_v17 }
  0x23   :  { %1593 = vxpose.xlu0.b32.cont [4/16] (narrow) %v1592_v22, 32  ;;  %v46_v22 = vld [vmem:[#allocation2 + $0x70] sm:$0xff] }
  0x25   :  { %1645 = vxpose.xlu1.b32.cont [4/16] (narrow) %v1644_v23, 32  ;;  %v62_v23 = vld [vmem:[#allocation2 + $0xf0] sm:$0xff] }
  0x26   :  { %v1666_v25 = vpack.i.bf16 %v46_v22, %v62_v23 }
  0x2b   :  { %1595 = vxpose.xlu0.b32.cont [5/16] (narrow) %v1594_v28, 32  ;;  %v47_v28 = vld [vmem:[#allocation2 + $0x78] sm:$0xff] }
  0x2d   :  { %1647 = vxpose.xlu1.b32.cont [5/16] (narrow) %v1646_v29, 32  ;;  %v63_v29 = vld [vmem:[#allocation2 + $0xf8] sm:$0xff] }
  0x2e   :  { %v1668_v31 = vpack.i.bf16 %v47_v28, %v63_v29 }
  0x33   :  { %1597 = vxpose.xlu0.b32.cont [6/16] (narrow) %v1596_v34, 32  ;;  %v1796_v34 = vmov 0  }
  0x34   :  { %1690 = vset.pattern.permute.xlu2 %v1796_v34 }
  0x35   :  { %1649 = vxpose.xlu1.b32.cont [6/16] (narrow) %v1648_v35, 32  ;;  %v1835_v35 = vld [vmem:[%s2602_s2] sm:$0xff] }
  0x36   :  { %242 = vperm.xlu2 %1690, %v1835_v35  }
  0x3b   :  { %1599 = vxpose.xlu0.b32.cont [7/16] (narrow) %v1598_v40, 32 }
  0x3d   :  { %1651 = vxpose.xlu1.b32.cont [7/16] (narrow) %v1650_v41, 32  ;;  %v1847_v41 = vld [vmem:[%s2602_s2 + $0x10] sm:$0xff] }
  0x3e   :  { %247 = vperm.xlu2 %1690, %v1841_v38  }
  0x43   :  { %1601 = vxpose.xlu0.b32.cont [8/16] (narrow) %v1600_v46, 32 }
  0x45   :  { %1653 = vxpose.xlu1.b32.cont [8/16] (narrow) %v1652_v47, 32 }
  0x46   :  { %252 = vperm.xlu2 %1690, %v1847_v41  }
  0x4b   :  { %1603 = vxpose.xlu0.b32.cont [9/16] (narrow) %v1602_v52, 32 }
  0x4d   :  { %1655 = vxpose.xlu1.b32.cont [9/16] (narrow) %v1654_v53, 32 }
  0x4e   :  { %257 = vperm.xlu2 %1690, %v1853_v62  }
  0x53   :  { %1605 = vxpose.xlu0.b32.cont [10/16] (narrow) %v1604_v58, 32 }
  0x55   :  { %1657 = vxpose.xlu1.b32.cont [10/16] (narrow) %v1656_v59, 32 }
  0x5b   :  { %1607 = vxpose.xlu0.b32.cont [11/16] (narrow) %v1606_v0, 32 }
  0x5d   :  { %1659 = vxpose.xlu1.b32.cont [11/16] (narrow) %v1658_v1, 32 }
  0x63   :  { %1609 = vxpose.xlu0.b32.cont [12/16] (narrow) %v1608_v6, 32  ;;  %v1797_v6 = vmov 1  }
  0x64   :  { %1691 = vset.pattern.permute.xlu2 %v1797_v6 }
  0x65   :  { %1661 = vxpose.xlu1.b32.cont [12/16] (narrow) %v1660_v7, 32  ;;  %553 = vperm.xlu2 %1691, %v1847_v41   ;;  %v1565_v7 = vld [vmem:[%s2601_s1 + $0x8] sm:$0xff] }
  0x6b   :  { %1611 = vxpose.xlu0.b32.cont [13/16] (narrow) %v1610_v12, 32 }
  0x6d   :  { %1663 = vxpose.xlu1.b32.cont [13/16] (narrow) %v1662_v13, 32  ;;  %557 = vperm.xlu2 %1691, %v1853_v62   ;;  %v1799_v13 = vmov 32.0  }
  0x6e   :  { %1711 = vrcp.f32 %v1799_v13 }
  0x73   :  { %1613 = vxpose.xlu0.b32.cont [14/16] (narrow) %v1612_v18, 32 }
  0x74   :  { %v1712_v16 = vpop.eup %1711 }
  0x75   :  { %1665 = vxpose.xlu1.b32.cont [14/16] (narrow) %v1664_v19, 32  ;;  %1692 = vset.pattern.permute.xlu2 %v1798_v8  ;;  %v390_v20 = vmul.f32 32.0, %v1712_v16  ;;  %vm394_vm1 = vweird.f32 %v1712_v16 }
  0x76   :  { %585 = vperm.xlu2 %1692, %v1847_v41  }
  0x77   :  { %v391_v23 = vsub.f32 1.0, %v390_v20 }
  0x79   :  { %v392_v26 = vmul.f32 %v1712_v16, %v391_v23 }
  0x7b   :  { %1615 = vxpose.xlu0.b32.cont [15/16] (narrow) %v1614_v24, 32 }
  0x7d   :  { %1667 = vxpose.xlu1.b32.cont [15/16] (narrow) %v1666_v25, 32 }
  0x7e   :  { %589 = vperm.xlu2 %1692, %v1853_v62  }
  0x83   :  { %1617 = vxpose.xlu0.b32.end [16/16] (narrow) %v1616_v30, 32 }
  0x85   :  { %1669 = vxpose.xlu1.b32.end [16/16] (narrow) %v1668_v31, 32 }
  0x86   :  { %1693 = vset.pattern.permute.xlu2 %v1797_v6 }
  0x87   :  { %545 = vperm.xlu2 %1693, %v1835_v35  }
  0x8f   :  { %549 = vperm.xlu2 %1693, %v1841_v38  }
  0x90   :  { %v243_v9 = vpop.permute.xlu2 %242 }
  0x97   :  { %1694 = vset.pattern.permute.xlu2 %v1798_v8 }
  0x98   :  { %577 = vperm.xlu2 %1694, %v1835_v35   ;;  %v248_v10 = vpop.permute.xlu2 %247 }
  0xa0   :  { %581 = vperm.xlu2 %1694, %v1841_v38   ;;  %v253_v11 = vpop.permute.xlu2 %252 }
  0xa8   :  { %v1878_v12 = vpop.permute.xlu2 %257 }
  0xaf   :  { %v1618_v32 = vpop.trf.xlu0 }
  0xb0   :  { %v1619_v63 = vunpack.i.l.bf16 %v1618_v32  ;;  %v1622_v0 = vunpack.i.h.bf16 %v1618_v32 }
  0xb1   :  { %v1670_v33 = vpop.trf.xlu1 }
  0xb2   :  { %v1674_v42 = vunpack.i.h.bf16 %v1670_v33  ;;  %v1671_v43 = vunpack.i.l.bf16 %v1670_v33 }
  0xb7   :  { %v1623_v36 = vpop.trf.xlu0 }
  0xb8   :  { %v1624_v56 = vunpack.i.l.bf16 %v1623_v36  ;;  %v1627_v57 = vunpack.i.h.bf16 %v1623_v36 }
  0xb9   :  { %v1675_v37 = vpop.trf.xlu1 }
  0xba   :  { %v1679_v60 = vunpack.i.h.bf16 %v1675_v37  ;;  %v1676_v61 = vunpack.i.l.bf16 %v1675_v37  ;;  %v234_v1 = vpack.c.bf16 %v1624_v56, %v1619_v63  ;;  %v235_v2 = vpack.c.bf16 %v1627_v57, %v1622_v0 }
  0xbb   :  { %v393_v37 = vadd.f32 %v1712_v16, %v392_v26 }
  0xbc   :  { %v232_v3 = vpack.c.bf16 %v1679_v60, %v1674_v42  ;;  %v233_v4 = vpack.c.bf16 %v1676_v61, %v1671_v43 }
  0xbf   :  { %v1628_v39 = vpop.trf.xlu0  ;;  %v1880_v17 = vpop.permute.xlu2 %553 }
  0xc0   :  { %v1629_v47 = vunpack.i.l.bf16 %v1628_v39  ;;  %v1632_v48 = vunpack.i.h.bf16 %v1628_v39 }
  0xc1   :  { %v1680_v40 = vpop.trf.xlu1 }
  0xc2   :  { %v1684_v45 = vunpack.i.h.bf16 %v1680_v40  ;;  %v1681_v46 = vunpack.i.l.bf16 %v1680_v40 }
  0xc7   :  { %v1633_v44 = vpop.trf.xlu0  ;;  %v1886_v29 = vpop.permute.xlu2 %557 }
  0xc8   :  { %v1634_v50 = vunpack.i.l.bf16 %v1633_v44  ;;  %v1637_v51 = vunpack.i.h.bf16 %v1633_v44 }
  0xc9   :  { %v1685_v49 = vpop.trf.xlu1 }
  0xca   :  { %v1689_v52 = vunpack.i.h.bf16 %v1685_v49  ;;  %v1686_v53 = vunpack.i.l.bf16 %v1685_v49  ;;  %v238_v54 = vpack.c.bf16 %v1634_v50, %v1629_v47  ;;  %v239_v55 = vpack.c.bf16 %v1637_v51, %v1632_v48 }
  0xcc   :  { %v236_v58 = vpack.c.bf16 %v1689_v52, %v1684_v45  ;;  %v237_v59 = vpack.c.bf16 %v1686_v53, %v1681_v46  ;;  %321 = vmatpush.bf16.msra.mxu2 %v238_v54  ;;  %340 = vmatpush.bf16.msra.mxu3 %v239_v55  ;;  %v1916_v52 = vsel %vm394_vm1, %v1712_v16, %v393_v37 }
  0xce   :  { %283 = vmatpush.bf16.msra.mxu0 %v236_v58  ;;  %302 = vmatpush.bf16.msra.mxu1 %v237_v59 }
  0xd0   :  { %322 = vmatpush.bf16.msra.mxu2 %v234_v1  ;;  %341 = vmatpush.bf16.msra.mxu3 %v235_v2  ;;  %v1946_v8 = vpop.permute.xlu2 %585 }
  0xd2   :  { %284 = vmatpush.bf16.msra.mxu0 %v232_v3  ;;  %303 = vmatpush.bf16.msra.mxu1 %v233_v4 }
  0xd3   :  { %1520 = vmatmul.msk.bf16.vlgmr.msra.gmra.mxu2 %vm270_vm0, %v1564_v5  ;;  %1522 = vmatmul.msk.bf16.vlgmr.msra.gmra.mxu3 %vm270_vm0, %v1564_v5 }
  0xd5   :  { %1516 = vmatmul.msk.bf16.vlgmr.msra.gmra.mxu0 %vm270_vm0, %v1564_v5  ;;  %1518 = vmatmul.msk.bf16.vlgmr.msra.gmra.mxu1 %vm270_vm0, %v1564_v5 }
  0xe3   :  { %1521 = vmatmul.msk.bf16.gmra.mxu2 %vm270_vm0, %v1565_v7  ;;  %1523 = vmatmul.msk.bf16.gmra.mxu3 %vm270_vm0, %v1565_v7 }
  0xe5   :  { %1517 = vmatmul.msk.bf16.gmra.mxu0 %vm270_vm0, %v1565_v7  ;;  %1519 = vmatmul.msk.bf16.gmra.mxu1 %vm270_vm0, %v1565_v7 }
 0x152   :  { %v286_v14 = vpop.f32.mrf.mxu0  ;;  %v305_v15 = vpop.f32.mrf.mxu1 }
 0x153   :  { %v1888_v30 = vadd.f32 %v286_v14, %v243_v9  ;;  %v1890_v33 = vadd.f32 %v305_v15, %v243_v9 }
 0x155   :  { %v400_v44 = vmul.f32 %v1888_v30, %v1888_v30  ;;  %v401_v47 = vmul.f32 %v1890_v33, %v1890_v33 }
 0x156   :  { %v324_v18 = vpop.f32.mrf.mxu2  ;;  %v343_v19 = vpop.f32.mrf.mxu3 }
 0x157   :  { %v1892_v34 = vadd.f32 %v324_v18, %v243_v9  ;;  %v1894_v36 = vadd.f32 %v343_v19, %v243_v9 }
 0x159   :  { %v402_v48 = vmul.f32 %v1892_v34, %v1892_v34  ;;  %v403_v49 = vmul.f32 %v1894_v36, %v1894_v36 }
 0x15a   :  { %v288_v21 = vpop.f32.mrf.mxu0  ;;  %v307_v22 = vpop.f32.mrf.mxu1 }
 0x15b   :  { %v1882_v27 = vadd.f32 %v288_v21, %v248_v10  ;;  %v1884_v28 = vadd.f32 %v307_v22, %v248_v10 }
 0x15d   :  { %v404_v42 = vmul.f32 %v1882_v27, %v1882_v27  ;;  %v405_v43 = vmul.f32 %v1884_v28, %v1884_v28  ;;  %v353_v57 = vadd.f32 %v1882_v27, %v1888_v30  ;;  %v362_v59 = vadd.f32 %v1884_v28, %v1890_v33 }
 0x15e   :  { %v326_v24 = vpop.f32.mrf.mxu2  ;;  %v345_v25 = vpop.f32.mrf.mxu3 }
 0x15f   :  { %v1906_v45 = vadd.f32 %v326_v24, %v248_v10  ;;  %v1908_v46 = vadd.f32 %v345_v25, %v248_v10  ;;  %v416_v58 = vadd.f32 %v404_v42, %v400_v44  ;;  %v425_v60 = vadd.f32 %v405_v43, %v401_v47 }
 0x161   :  { %v371_v61 = vadd.f32 %v1906_v45, %v1892_v34  ;;  %v406_v63 = vmul.f32 %v1906_v45, %v1906_v45  ;;  %v380_v0 = vadd.f32 %v1908_v46, %v1894_v36  ;;  %v407_v1 = vmul.f32 %v1908_v46, %v1908_v46 }
 0x162   :  { %v291_v31 = vpop.f32.mrf.mxu0  ;;  %v310_v32 = vpop.f32.mrf.mxu1 }
 0x163   :  { %v1896_v39 = vadd.f32 %v291_v31, %v253_v11  ;;  %v1898_v40 = vadd.f32 %v310_v32, %v253_v11  ;;  %v434_v19 = vadd.f32 %v406_v63, %v402_v48  ;;  %v443_v20 = vadd.f32 %v407_v1, %v403_v49 }
 0x165   :  { %v408_v53 = vmul.f32 %v1896_v39, %v1896_v39  ;;  %v409_v54 = vmul.f32 %v1898_v40, %v1898_v40  ;;  %v354_v4 = vadd.f32 %v353_v57, %v1896_v39  ;;  %v363_v5 = vadd.f32 %v362_v59, %v1898_v40 }
 0x166   :  { %v329_v50 = vpop.f32.mrf.mxu2  ;;  %v348_v51 = vpop.f32.mrf.mxu3 }
 0x167   :  { %v1922_v55 = vadd.f32 %v329_v50, %v253_v11  ;;  %v1924_v56 = vadd.f32 %v348_v51, %v253_v11  ;;  %v417_v9 = vadd.f32 %v416_v58, %v408_v53  ;;  %v426_v10 = vadd.f32 %v425_v60, %v409_v54 }
 0x169   :  { %v410_v11 = vmul.f32 %v1922_v55, %v1922_v55  ;;  %v411_v13 = vmul.f32 %v1924_v56, %v1924_v56  ;;  %v372_v21 = vadd.f32 %v371_v61, %v1922_v55  ;;  %v381_v22 = vadd.f32 %v380_v0, %v1924_v56 }
 0x16a   :  { %v293_v2 = vpop.f32.mrf.mxu0  ;;  %v312_v3 = vpop.f32.mrf.mxu1 }
 0x16b   :  { %v1941_v6 = vadd.f32 %v293_v2, %v1878_v12  ;;  %v1944_v7 = vadd.f32 %v312_v3, %v1878_v12  ;;  %v435_v37 = vadd.f32 %v434_v19, %v410_v11  ;;  %v444_v42 = vadd.f32 %v443_v20, %v411_v13 }
 0x16d   :  { %v355_v14 = vadd.f32 %v354_v4, %v1941_v6  ;;  %v412_v15 = vmul.f32 %v1941_v6, %v1941_v6  ;;  %v364_v16 = vadd.f32 %v363_v5, %v1944_v7  ;;  %v413_v18 = vmul.f32 %v1944_v7, %v1944_v7 }
 0x16e   :  { %v331_v31 = vpop.f32.mrf.mxu2  ;;  %v350_v32 = vpop.f32.mrf.mxu3 }
 0x16f   :  { %v356_v23 = vrot.slane %v355_v14, 4  ;;  %v418_v24 = vadd.f32 %v417_v9, %v412_v15  ;;  %v365_v25 = vrot.slane %v364_v16, 4  ;;  %v427_v26 = vadd.f32 %v426_v10, %v413_v18  ;;  %v1972_v9 = vpop.permute.xlu2 %589 }
 0x170   :  { %v1961_v43 = vadd.f32 %v331_v31, %v1878_v12  ;;  %v1964_v44 = vadd.f32 %v350_v32, %v1878_v12 }
 0x171   :  { %v357_v47 = vadd.f32 %v356_v23, %v355_v14  ;;  %v419_v48 = vrot.slane %v418_v24, 4  ;;  %v366_v49 = vadd.f32 %v365_v25, %v364_v16  ;;  %v428_v50 = vrot.slane %v427_v26, 4 }
 0x172   :  { %v373_v51 = vadd.f32 %v372_v21, %v1961_v43  ;;  %v414_v53 = vmul.f32 %v1961_v43, %v1961_v43  ;;  %v382_v54 = vadd.f32 %v381_v22, %v1964_v44  ;;  %v415_v57 = vmul.f32 %v1964_v44, %v1964_v44 }
 0x173   :  { %v358_v58 = vrot.slane %v357_v47, 2  ;;  %v420_v59 = vadd.f32 %v419_v48, %v418_v24  ;;  %v367_v60 = vrot.slane %v366_v49, 2  ;;  %v429_v61 = vadd.f32 %v428_v50, %v427_v26 }
 0x174   :  { %v374_v12 = vrot.slane %v373_v51, 4  ;;  %v436_v63 = vadd.f32 %v435_v37, %v414_v53  ;;  %v383_v0 = vrot.slane %v382_v54, 4  ;;  %v445_v1 = vadd.f32 %v444_v42, %v415_v57 }
 0x175   :  { %v359_v2 = vadd.f32 %v358_v58, %v357_v47  ;;  %v421_v3 = vrot.slane %v420_v59, 2  ;;  %v368_v4 = vadd.f32 %v367_v60, %v366_v49  ;;  %v430_v5 = vrot.slane %v429_v61, 2 }
 0x176   :  { %v375_v10 = vadd.f32 %v374_v12, %v373_v51  ;;  %v437_v11 = vrot.slane %v436_v63, 4  ;;  %v384_v13 = vadd.f32 %v383_v0, %v382_v54  ;;  %v446_v14 = vrot.slane %v445_v1, 4 }
 0x177   :  { %v360_v15 = vrot.slane %v359_v2, 1  ;;  %v422_v16 = vadd.f32 %v421_v3, %v420_v59  ;;  %v369_v18 = vrot.slane %v368_v4, 1  ;;  %v431_v19 = vadd.f32 %v430_v5, %v429_v61 }
 0x178   :  { %v376_v20 = vrot.slane %v375_v10, 2  ;;  %v438_v21 = vadd.f32 %v437_v11, %v436_v63  ;;  %v385_v22 = vrot.slane %v384_v13, 2  ;;  %v447_v23 = vadd.f32 %v446_v14, %v445_v1 }
 0x179   :  { %v361_v24 = vadd.f32 %v360_v15, %v359_v2  ;;  %v423_v25 = vrot.slane %v422_v16, 1  ;;  %v370_v26 = vadd.f32 %v369_v18, %v368_v4  ;;  %v432_v31 = vrot.slane %v431_v19, 1  ;;  %v1986_v4 = vpop.permute.xlu2 %545 }
 0x17a   :  { %v377_v32 = vadd.f32 %v376_v20, %v375_v10  ;;  %v439_v37 = vrot.slane %v438_v21, 2  ;;  %v386_v42 = vadd.f32 %v385_v22, %v384_v13  ;;  %v448_v47 = vrot.slane %v447_v23, 2 }
 0x17b   :  { %v1975_v48 = vmul.f32 %v1916_v52, %v361_v24  ;;  %v424_v49 = vadd.f32 %v423_v25, %v422_v16  ;;  %v1978_v50 = vmul.f32 %v1916_v52, %v370_v26  ;;  %v433_v51 = vadd.f32 %v432_v31, %v431_v19 }
 0x17c   :  { %v378_v53 = vrot.slane %v377_v32, 1  ;;  %v440_v54 = vadd.f32 %v439_v37, %v438_v21  ;;  %v387_v57 = vrot.slane %v386_v42, 1  ;;  %v449_v58 = vadd.f32 %v448_v47, %v447_v23 }
 0x17d   :  { %v452_v59 = vmul.f32 %v424_v49, %v1916_v52  ;;  %v456_v60 = vmul.f32 %v1975_v48, %v1975_v48  ;;  %v453_v61 = vmul.f32 %v433_v51, %v1916_v52  ;;  %v457_v12 = vmul.f32 %v1978_v50, %v1978_v50 }
 0x17e   :  { %v379_v63 = vadd.f32 %v378_v53, %v377_v32  ;;  %v441_v0 = vrot.slane %v440_v54, 1  ;;  %v388_v2 = vadd.f32 %v387_v57, %v386_v42  ;;  %v450_v3 = vrot.slane %v449_v58, 1 }
 0x17f   :  { %v460_v1 = vsub.f32 %v452_v59, %v456_v60  ;;  %v461_v5 = vsub.f32 %v453_v61, %v457_v12  ;;  %v480_v53 = vsub.f32 %v1941_v6, %v1975_v48  ;;  %v468_v59 = vsub.f32 %v1888_v30, %v1975_v48 }
 0x180   :  { %v1989_v10 = vmul.f32 %v1916_v52, %v379_v63  ;;  %v442_v11 = vadd.f32 %v441_v0, %v440_v54  ;;  %v1992_v14 = vmul.f32 %v1916_v52, %v388_v2  ;;  %v451_v15 = vadd.f32 %v450_v3, %v449_v58 }
 0x181   :  { %v464_v13 = vmax.f32 %v460_v1, 0.0  ;;  %v465_v16 = vmax.f32 %v461_v5, 0.0  ;;  %v2004_v42 = vpop.permute.xlu2 %549  ;;  %v481_v54 = vsub.f32 %v1944_v7, %v1978_v50  ;;  %v469_v60 = vsub.f32 %v1890_v33, %v1978_v50 }
 0x182   :  { %v454_v18 = vmul.f32 %v442_v11, %v1916_v52  ;;  %v458_v19 = vmul.f32 %v1989_v10, %v1989_v10  ;;  %v455_v21 = vmul.f32 %v451_v15, %v1916_v52  ;;  %v459_v22 = vmul.f32 %v1992_v14, %v1992_v14 }
 0x183   :  { %v484_v20 = vadd.f32 1e-05, %v464_v13  ;;  %v485_v23 = vadd.f32 1e-05, %v465_v16  ;;  %v472_v61 = vsub.f32 %v1882_v27, %v1975_v48  ;;  %v482_v63 = vsub.f32 %v1961_v43, %v1989_v10 }
 0x184   :  { %v462_v24 = vsub.f32 %v454_v18, %v458_v19  ;;  %v463_v25 = vsub.f32 %v455_v21, %v459_v22  ;;  %v483_v6 = vsub.f32 %v1964_v44, %v1992_v14  ;;  %v470_v7 = vsub.f32 %v1892_v34, %v1989_v10 }
 0x185   :  { %1713 = vrsqrt.f32 %v484_v20  ;;  %vm494_vm2 = vweird.f32 %v484_v20  ;;  %v471_v30 = vsub.f32 %v1894_v36, %v1992_v14  ;;  %v473_v33 = vsub.f32 %v1884_v28, %v1978_v50 }
 0x186   :  { %1715 = vrsqrt.f32 %v485_v23  ;;  %v466_v26 = vmax.f32 %v462_v24, 0.0  ;;  %v467_v31 = vmax.f32 %v463_v25, 0.0  ;;  %vm504_vm3 = vweird.f32 %v485_v23 }
 0x187   :  { %v474_v44 = vsub.f32 %v1906_v45, %v1989_v10  ;;  %v475_v5 = vsub.f32 %v1908_v46, %v1992_v14  ;;  %v476_v28 = vsub.f32 %v1896_v39, %v1975_v48  ;;  %v477_v45 = vsub.f32 %v1898_v40, %v1978_v50 }
 0x188   :  { %v2000_v32 = vadd.f32 1e-05, %v466_v26  ;;  %v2002_v37 = vadd.f32 1e-05, %v467_v31  ;;  %v478_v18 = vsub.f32 %v1922_v55, %v1989_v10  ;;  %v479_v21 = vsub.f32 %v1924_v56, %v1992_v14  ;;  %v1566_v56 = vld [vmem:[%s2601_s1 + $0x10] sm:$0xff] }
 0x189   :  { %v2034_v13 = vpop.permute.xlu2 %577 }
 0x18a   :  { %1717 = vrsqrt.f32 %v2000_v32  ;;  %vm514_vm7 = vweird.f32 %v2000_v32  ;;  %vm524_vm10 = vweird.f32 %v2002_v37 }
 0x18b   :  { %v1714_v47 = vpop.eup %1713  ;;  %1719 = vrsqrt.f32 %v2002_v37 }
 0x18c   :  { %v1716_v49 = vpop.eup %1715  ;;  %v489_v51 = vmul.f32 %v1714_v47, %v484_v20  ;;  %vm495_vm4 = vweird.f32 %v1714_v47 }
 0x18d   :  { %v499_v57 = vmul.f32 %v1716_v49, %v485_v23  ;;  %vm505_vm5 = vweird.f32 %v1716_v49  ;;  %vm496_vm6 = vmor %vm494_vm2, %vm495_vm4 }
 0x18e   :  { %v490_v58 = vmul.f32 %v1714_v47, %v489_v51  ;;  %vm506_vm8 = vmor %vm504_vm3, %vm505_vm5 }
 0x18f   :  { %v500_v12 = vmul.f32 %v1716_v49, %v499_v57 }
 0x190   :  { %v1718_v0 = vpop.eup %1717  ;;  %v491_v1 = vmul.f32 0.5, %v490_v58 }
 0x191   :  { %v1720_v27 = vpop.eup %1719  ;;  %v501_v2 = vmul.f32 0.5, %v500_v12  ;;  %v509_v43 = vmul.f32 %v1718_v0, %v2000_v32  ;;  %vm515_vm9 = vweird.f32 %v1718_v0 }
 0x192   :  { %v492_v3 = vsub.f32 1.5, %v491_v1  ;;  %v519_v34 = vmul.f32 %v1720_v27, %v2002_v37  ;;  %vm525_vm11 = vweird.f32 %v1720_v27  ;;  %vm516_vm12 = vmor %vm514_vm7, %vm515_vm9 }
 0x193   :  { %v502_v11 = vsub.f32 1.5, %v501_v2  ;;  %v510_v36 = vmul.f32 %v1718_v0, %v509_v43  ;;  %vm526_vm13 = vmor %vm524_vm10, %vm525_vm11  ;;  %v582_v43 = vpop.permute.xlu2 %581 }
 0x194   :  { %v493_v15 = vmul.f32 %v1714_v47, %v492_v3  ;;  %v520_v16 = vmul.f32 %v1720_v27, %v519_v34 }
 0x195   :  { %v503_v19 = vmul.f32 %v1716_v49, %v502_v11  ;;  %v511_v46 = vmul.f32 0.5, %v510_v36 }
 0x196   :  { %v497_v22 = vsel %vm496_vm6, %v1714_v47, %v493_v15  ;;  %v521_v39 = vmul.f32 0.5, %v520_v16 }
 0x197   :  { %v540_v40 = vmul.f32 %v497_v22, %v480_v53  ;;  %v507_v48 = vsel %vm506_vm8, %v1716_v49, %v503_v19  ;;  %v512_v50 = vsub.f32 1.5, %v511_v46  ;;  %v528_v55 = vmul.f32 %v497_v22, %v468_v59 }
 0x198   :  { %v522_v10 = vsub.f32 1.5, %v521_v39  ;;  %v529_v20 = vmul.f32 %v507_v48, %v469_v60  ;;  %v532_v24 = vmul.f32 %v497_v22, %v472_v61  ;;  %v541_v25 = vmul.f32 %v507_v48, %v481_v54 }
 0x199   :  { %v513_v26 = vmul.f32 %v1718_v0, %v512_v50  ;;  %v533_v31 = vmul.f32 %v507_v48, %v473_v33  ;;  %v536_v51 = vmul.f32 %v497_v22, %v476_v28  ;;  %v560_v47 = vmul.f32 %v1986_v4, %v528_v55 }
 0x19a   :  { %v523_v23 = vmul.f32 %v1720_v27, %v522_v10  ;;  %v561_v53 = vmul.f32 %v1986_v4, %v529_v20  ;;  %v572_v49 = vmul.f32 %v1886_v29, %v540_v40  ;;  %v564_v54 = vmul.f32 %v2004_v42, %v532_v24 }
 0x19b   :  { %v517_v57 = vsel %vm516_vm12, %v1718_v0, %v513_v26  ;;  %v568_v58 = vmul.f32 %v1880_v17, %v536_v51  ;;  %v537_v59 = vmul.f32 %v507_v48, %v477_v45  ;;  %v565_v12 = vmul.f32 %v2004_v42, %v533_v31 }
 0x19c   :  { %v527_v60 = vsel %vm526_vm13, %v1720_v27, %v523_v23  ;;  %v530_v61 = vmul.f32 %v517_v57, %v470_v7  ;;  %v534_v32 = vmul.f32 %v517_v57, %v474_v44  ;;  %v542_v1 = vmul.f32 %v517_v57, %v482_v63 }
 0x19d   :  { %v543_v33 = vmul.f32 %v527_v60, %v483_v6  ;;  %v531_v2 = vmul.f32 %v527_v60, %v471_v30  ;;  %v600_v3 = vadd.f32 %v1946_v8, %v568_v58  ;;  %v535_v37 = vmul.f32 %v527_v60, %v475_v5 }
 0x19e   :  { %v562_v0 = vmul.f32 %v1986_v4, %v530_v61  ;;  %v604_v34 = vadd.f32 %v1972_v9, %v572_v49  ;;  %v569_v11 = vmul.f32 %v1880_v17, %v537_v59  ;;  %v566_v7 = vmul.f32 %v2004_v42, %v534_v32 }
 0x19f   :  { %v563_v36 = vmul.f32 %v1986_v4, %v531_v2  ;;  %v616_v27 = vmax.f32 %v600_v3, 0.0  ;;  %v573_v44 = vmul.f32 %v1886_v29, %v541_v25  ;;  %v592_v30 = vadd.f32 %v2034_v13, %v560_v47 }
 0x1a0   :  { %v620_v63 = vmax.f32 %v604_v34, 0.0  ;;  %v601_v6 = vadd.f32 %v1946_v8, %v569_v11  ;;  %v596_v28 = vadd.f32 %v582_v43, %v564_v54  ;;  %v593_v5 = vadd.f32 %v2034_v13, %v561_v53 }
 0x1a1   :  { %v605_v15 = vadd.f32 %v1972_v9, %v573_v44  ;;  %v597_v16 = vadd.f32 %v582_v43, %v565_v12  ;;  %v538_v45 = vmul.f32 %v517_v57, %v478_v18  ;;  %v608_v4 = vmax.f32 %v592_v30, 0.0 }
 0x1a2   :  { %v633_v19 = vpack.c.bf16 %v620_v63, %v616_v27  ;;  %v617_v46 = vmax.f32 %v601_v6, 0.0  ;;  %v612_v22 = vmax.f32 %v596_v28, 0.0  ;;  %v567_v39 = vmul.f32 %v2004_v42, %v535_v37 }
 0x1a3   :  { %v621_v40 = vmax.f32 %v605_v15, 0.0  ;;  %v609_v48 = vmax.f32 %v593_v5, 0.0  ;;  %v570_v50 = vmul.f32 %v1880_v17, %v538_v45  ;;  %v613_v55 = vmax.f32 %v597_v16, 0.0 }
 0x1a4   :  { %675 = vmatpush.bf16.msrb.mxu0 %v633_v19  ;;  %v574_v10 = vmul.f32 %v1886_v29, %v542_v1  ;;  %v539_v20 = vmul.f32 %v527_v60, %v479_v21  ;;  %v575_v18 = vmul.f32 %v1886_v29, %v543_v33  ;;  %v629_v25 = vpack.c.bf16 %v612_v22, %v608_v4  ;;  %v1567_v33 = vld [vmem:[%s2601_s1 + $0x18] sm:$0xff] }
 0x1a5   :  { %v634_v24 = vpack.c.bf16 %v621_v40, %v617_v46  ;;  %v602_v26 = vadd.f32 %v1946_v8, %v570_v50  ;;  %v594_v42 = vadd.f32 %v2034_v13, %v562_v0  ;;  %v598_v47 = vadd.f32 %v582_v43, %v566_v7 }
 0x1a6   :  { %v606_v31 = vadd.f32 %v1972_v9, %v574_v10  ;;  %v571_v51 = vmul.f32 %v1880_v17, %v539_v20  ;;  %v607_v23 = vadd.f32 %v1972_v9, %v575_v18  ;;  %v595_v29 = vadd.f32 %v2034_v13, %v563_v36 }
 0x1a7   :  { %694 = vmatpush.bf16.msrb.mxu1 %v634_v24  ;;  %v618_v53 = vmax.f32 %v602_v26, 0.0  ;;  %v599_v57 = vadd.f32 %v582_v43, %v567_v39  ;;  %v630_v54 = vpack.c.bf16 %v613_v55, %v609_v48  ;;  %v610_v59 = vmax.f32 %v594_v42, 0.0 }
 0x1a8   :  { %676 = vmatpush.bf16.msrb.mxu0 %v629_v25  ;;  %v622_v14 = vmax.f32 %v606_v31, 0.0  ;;  %v603_v21 = vadd.f32 %v1946_v8, %v571_v51  ;;  %v623_v49 = vmax.f32 %v607_v23, 0.0  ;;  %v614_v9 = vmax.f32 %v598_v47, 0.0 }
 0x1a9   :  { %v1800_v60 = vmov 3   ;;  %v611_v32 = vmax.f32 %v595_v29, 0.0  ;;  %v615_v13 = vmax.f32 %v599_v57, 0.0  ;;  %v1801_v1 = vmov 4  }
 0x1aa   :  { %v635_v58 = vpack.c.bf16 %v622_v14, %v618_v53  ;;  %v619_v17 = vmax.f32 %v603_v21, 0.0  ;;  %1695 = vset.pattern.permute.xlu2 %v1800_v60  ;;  %v631_v8 = vpack.c.bf16 %v614_v9, %v610_v59  ;;  %1696 = vset.pattern.permute.xlu0 %v1801_v1  ;;  %v1802_v2 = vmov 5  }
 0x1ab   :  { %695 = vmatpush.bf16.msrb.mxu1 %v630_v54  ;;  %1536 = vmatmul.msk.bf16.vlgmr.msrb.gmra.mxu0 %vm270_vm0, %v1566_v56  ;;  %v632_v12 = vpack.c.bf16 %v615_v13, %v611_v32 }
 0x1ac   :  { %713 = vmatpush.bf16.msrb.mxu2 %v635_v58  ;;  %v636_v61 = vpack.c.bf16 %v623_v49, %v619_v17  ;;  %638 = vperm.xlu2 %1695, %v1835_v35  }
 0x1ad   :  { %1697 = vset.pattern.permute.xlu1 %v1801_v1  ;;  %938 = vperm.xlu0 %1696, %v1847_v41  }
 0x1ae   :  { %732 = vmatpush.bf16.msrb.mxu3 %v636_v61  ;;  %1538 = vmatmul.msk.bf16.vlgmr.msrb.gmra.mxu1 %vm270_vm0, %v1566_v56 }
 0x1af   :  { %942 = vperm.xlu1 %1697, %v1853_v62  }
 0x1b0   :  { %714 = vmatpush.bf16.msrb.mxu2 %v631_v8 }
 0x1b2   :  { %733 = vmatpush.bf16.msrb.mxu3 %v632_v12 }
 0x1b3   :  { %1540 = vmatmul.msk.bf16.vlgmr.msrb.gmra.mxu2 %vm270_vm0, %v1566_v56 }
 0x1b4   :  { %642 = vperm.xlu2 %1695, %v1841_v38  }
 0x1b5   :  { %1542 = vmatmul.msk.bf16.vlgmr.msrb.gmra.mxu3 %vm270_vm0, %v1566_v56 }
 0x1bb   :  { %1537 = vmatmul.msk.bf16.gmra.mxu0 %vm270_vm0, %v1567_v33 }
 0x1bc   :  { %646 = vperm.xlu2 %1695, %v1847_v41  }
 0x1be   :  { %1539 = vmatmul.msk.bf16.gmra.mxu1 %vm270_vm0, %v1567_v33 }
 0x1c3   :  { %1541 = vmatmul.msk.bf16.gmra.mxu2 %vm270_vm0, %v1567_v33 }
 0x1c4   :  { %650 = vperm.xlu2 %1695, %v1853_v62  }
 0x1c5   :  { %1543 = vmatmul.msk.bf16.gmra.mxu3 %vm270_vm0, %v1567_v33 }
 0x1cc   :  { %1698 = vset.pattern.permute.xlu2 %v1802_v2 }
 0x1cd   :  { %970 = vperm.xlu2 %1698, %v1847_v41  }
 0x1d5   :  { %974 = vperm.xlu2 %1698, %v1853_v62  }
 0x1dd   :  { %1699 = vset.pattern.permute.xlu2 %v1801_v1 }
 0x1de   :  { %930 = vperm.xlu2 %1699, %v1835_v35  }
 0x1e6   :  { %934 = vperm.xlu2 %1699, %v1841_v38  }
 0x1ee   :  { %1700 = vset.pattern.permute.xlu2 %v1802_v2 }
 0x1ef   :  { %962 = vperm.xlu2 %1700, %v1835_v35  }
 0x1f7   :  { %966 = vperm.xlu2 %1700, %v1841_v38  }
 0x206   :  { %v639_v43 = vpop.permute.xlu2 %638 }
 0x20e   :  { %v643_v3 = vpop.permute.xlu2 %642 }
 0x216   :  { %v2110_v34 = vpop.permute.xlu2 %646 }
 0x21e   :  { %v2112_v27 = vpop.permute.xlu2 %650 }
 0x227   :  { %v2144_v50 = vpop.permute.xlu2 %970 }
 0x228   :  { %v678_v0 = vpop.f32.mrf.mxu0 }
 0x229   :  { %v2114_v44 = vadd.f32 %v678_v0, %v639_v43 }
 0x22b   :  { %v697_v37 = vpop.f32.mrf.mxu1  ;;  %v785_v28 = vmul.f32 %v2114_v44, %v2114_v44 }
 0x22c   :  { %v2118_v35 = vadd.f32 %v697_v37, %v639_v43 }
 0x22e   :  { %v786_v45 = vmul.f32 %v2118_v35, %v2118_v35 }
 0x22f   :  { %v2179_v37 = vpop.permute.xlu2 %974 }
 0x230   :  { %v680_v11 = vpop.f32.mrf.mxu0 }
 0x231   :  { %v2116_v63 = vadd.f32 %v680_v11, %v643_v3 }
 0x233   :  { %v699_v41 = vpop.f32.mrf.mxu1  ;;  %v789_v15 = vmul.f32 %v2116_v63, %v2116_v63  ;;  %v745_v19 = vadd.f32 %v2116_v63, %v2114_v44 }
 0x234   :  { %v2120_v38 = vadd.f32 %v699_v41, %v643_v3 }
 0x235   :  { %v801_v55 = vadd.f32 %v789_v15, %v785_v28 }
 0x236   :  { %v716_v36 = vpop.f32.mrf.mxu2  ;;  %v790_v46 = vmul.f32 %v2120_v38, %v2120_v38  ;;  %v754_v10 = vadd.f32 %v2120_v38, %v2118_v35 }
 0x237   :  { %v2162_v49 = vadd.f32 %v716_v36, %v639_v43 }
 0x238   :  { %v735_v62 = vpop.f32.mrf.mxu3  ;;  %v683_v7 = vpop.f32.mrf.mxu0  ;;  %v810_v18 = vadd.f32 %v790_v46, %v786_v45 }
 0x239   :  { %v2123_v30 = vadd.f32 %v683_v7, %v2110_v34  ;;  %v2164_v57 = vadd.f32 %v735_v62, %v639_v43  ;;  %v787_v33 = vmul.f32 %v2162_v49, %v2162_v49 }
 0x23b   :  { %v702_v6 = vpop.f32.mrf.mxu1  ;;  %v793_v4 = vmul.f32 %v2123_v30, %v2123_v30  ;;  %v746_v40 = vadd.f32 %v745_v19, %v2123_v30  ;;  %v788_v2 = vmul.f32 %v2164_v57, %v2164_v57 }
 0x23c   :  { %v2130_v5 = vadd.f32 %v702_v6, %v2110_v34 }
 0x23d   :  { %v802_v26 = vadd.f32 %v801_v55, %v793_v4 }
 0x23e   :  { %v718_v16 = vpop.f32.mrf.mxu2  ;;  %v794_v20 = vmul.f32 %v2130_v5, %v2130_v5  ;;  %v755_v42 = vadd.f32 %v754_v10, %v2130_v5 }
 0x23f   :  { %v2157_v23 = vadd.f32 %v718_v16, %v643_v3 }
 0x240   :  { %v737_v22 = vpop.f32.mrf.mxu3  ;;  %v685_v39 = vpop.f32.mrf.mxu0  ;;  %v811_v53 = vadd.f32 %v810_v18, %v794_v20 }
 0x241   :  { %v2142_v48 = vadd.f32 %v685_v39, %v2112_v27  ;;  %v791_v61 = vmul.f32 %v2157_v23, %v2157_v23  ;;  %v2171_v32 = vadd.f32 %v737_v22, %v643_v3  ;;  %v763_v62 = vadd.f32 %v2157_v23, %v2162_v49 }
 0x243   :  { %v747_v24 = vadd.f32 %v746_v40, %v2142_v48  ;;  %v704_v25 = vpop.f32.mrf.mxu1  ;;  %v797_v31 = vmul.f32 %v2142_v48, %v2142_v48  ;;  %v819_v7 = vadd.f32 %v791_v61, %v787_v33  ;;  %v772_v6 = vadd.f32 %v2171_v32, %v2164_v57 }
 0x244   :  { %v2155_v51 = vadd.f32 %v704_v25, %v2112_v27  ;;  %v792_v15 = vmul.f32 %v2171_v32, %v2171_v32 }
 0x245   :  { %v748_v47 = vrot.slane %v747_v24, 4  ;;  %v803_v56 = vadd.f32 %v802_v26, %v797_v31 }
 0x246   :  { %v756_v29 = vadd.f32 %v755_v42, %v2155_v51  ;;  %v798_v14 = vmul.f32 %v2155_v51, %v2155_v51  ;;  %v721_v21 = vpop.f32.mrf.mxu2 }
 0x247   :  { %v749_v54 = vadd.f32 %v748_v47, %v747_v24  ;;  %v2167_v58 = vadd.f32 %v721_v21, %v2110_v34  ;;  %v804_v17 = vrot.slane %v803_v56, 4 }
 0x248   :  { %v757_v59 = vrot.slane %v756_v29, 4  ;;  %v812_v9 = vadd.f32 %v811_v53, %v798_v14  ;;  %v740_v60 = vpop.f32.mrf.mxu3 }
 0x249   :  { %v750_v13 = vrot.slane %v749_v54, 2  ;;  %v805_v8 = vadd.f32 %v804_v17, %v803_v56  ;;  %v795_v0 = vmul.f32 %v2167_v58, %v2167_v58  ;;  %v2182_v36 = vadd.f32 %v740_v60, %v2110_v34 }
 0x24a   :  { %v758_v12 = vadd.f32 %v757_v59, %v756_v29  ;;  %v813_v1 = vrot.slane %v812_v9, 4  ;;  %v764_v22 = vadd.f32 %v763_v62, %v2167_v58  ;;  %v828_v29 = vadd.f32 %v792_v15, %v788_v2 }
 0x24b   :  { %v751_v43 = vadd.f32 %v750_v13, %v749_v54  ;;  %v806_v11 = vrot.slane %v805_v8, 2  ;;  %v820_v34 = vadd.f32 %v819_v7, %v795_v0  ;;  %v796_v20 = vmul.f32 %v2182_v36, %v2182_v36 }
 0x24c   :  { %v759_v41 = vrot.slane %v758_v12, 2  ;;  %v814_v3 = vadd.f32 %v813_v1, %v812_v9  ;;  %v773_v56 = vadd.f32 %v772_v6, %v2182_v36 }
 0x24d   :  { %v752_v28 = vrot.slane %v751_v43, 1  ;;  %v807_v16 = vadd.f32 %v806_v11, %v805_v8  ;;  %v829_v60 = vadd.f32 %v828_v29, %v796_v20 }
 0x24e   :  { %v760_v45 = vadd.f32 %v759_v41, %v758_v12  ;;  %v815_v19 = vrot.slane %v814_v3, 2  ;;  %v723_v46 = vpop.f32.mrf.mxu2  ;;  %v2215_v12 = vpop.permute.xlu2 %930 }
 0x24f   :  { %v753_v4 = vadd.f32 %v752_v28, %v751_v43  ;;  %v2192_v39 = vadd.f32 %v723_v46, %v2112_v27  ;;  %v808_v40 = vrot.slane %v807_v16, 1 }
 0x250   :  { %v761_v55 = vrot.slane %v760_v45, 1  ;;  %v816_v10 = vadd.f32 %v815_v19, %v814_v3  ;;  %v742_v18 = vpop.f32.mrf.mxu3 }
 0x251   :  { %v2197_v24 = vmul.f32 %v753_v4, %v1916_v52  ;;  %v765_v25 = vadd.f32 %v764_v22, %v2192_v39  ;;  %v799_v26 = vmul.f32 %v2192_v39, %v2192_v39  ;;  %v2203_v42 = vadd.f32 %v742_v18, %v2112_v27 }
 0x252   :  { %v809_v31 = vadd.f32 %v808_v40, %v807_v16  ;;  %v762_v47 = vadd.f32 %v761_v55, %v760_v45  ;;  %v817_v53 = vrot.slane %v816_v10, 1 }
 0x253   :  { %v841_v14 = vmul.f32 %v2197_v24, %v2197_v24  ;;  %v766_v21 = vrot.slane %v765_v25, 4  ;;  %v821_v54 = vadd.f32 %v820_v34, %v799_v26  ;;  %v774_v27 = vadd.f32 %v773_v56, %v2203_v42 }
 0x254   :  { %v837_v17 = vmul.f32 %v809_v31, %v1916_v52  ;;  %v2210_v59 = vmul.f32 %v762_v47, %v1916_v52  ;;  %v818_v9 = vadd.f32 %v817_v53, %v816_v10  ;;  %v800_v8 = vmul.f32 %v2203_v42, %v2203_v42 }
 0x255   :  { %v767_v61 = vadd.f32 %v766_v21, %v765_v25  ;;  %v822_v13 = vrot.slane %v821_v54, 4  ;;  %v775_v11 = vrot.slane %v774_v27, 4 }
 0x256   :  { %v845_v1 = vsub.f32 %v837_v17, %v841_v14  ;;  %v838_v33 = vmul.f32 %v818_v9, %v1916_v52  ;;  %v842_v2 = vmul.f32 %v2210_v59, %v2210_v59  ;;  %v830_v41 = vadd.f32 %v829_v60, %v800_v8  ;;  %v2223_v47 = vpop.permute.xlu2 %934 }
 0x257   :  { %v768_v43 = vrot.slane %v767_v61, 2  ;;  %v823_v0 = vadd.f32 %v822_v13, %v821_v54  ;;  %v776_v28 = vadd.f32 %v775_v11, %v774_v27  ;;  %v865_v11 = vsub.f32 %v2142_v48, %v2197_v24 }
 0x258   :  { %v849_v3 = vmax.f32 %v845_v1, 0.0  ;;  %v846_v62 = vsub.f32 %v838_v33, %v842_v2  ;;  %v831_v15 = vrot.slane %v830_v41, 4  ;;  %v857_v48 = vsub.f32 %v2116_v63, %v2197_v24 }
 0x259   :  { %v769_v7 = vadd.f32 %v768_v43, %v767_v61  ;;  %v824_v6 = vrot.slane %v823_v0, 2  ;;  %v777_v4 = vrot.slane %v776_v28, 2 }
 0x25a   :  { %v869_v16 = vadd.f32 1e-05, %v849_v3  ;;  %v850_v45 = vmax.f32 %v846_v62, 0.0  ;;  %v832_v22 = vadd.f32 %v831_v15, %v830_v41  ;;  %v853_v3 = vsub.f32 %v2114_v44, %v2197_v24 }
 0x25b   :  { %v770_v19 = vrot.slane %v769_v7, 1  ;;  %v825_v46 = vadd.f32 %v824_v6, %v823_v0  ;;  %v778_v10 = vadd.f32 %v777_v4, %v776_v28  ;;  %v866_v28 = vsub.f32 %v2155_v51, %v2210_v59 }
 0x25c   :  { %1721 = vrsqrt.f32 %v869_v16  ;;  %v870_v34 = vadd.f32 1e-05, %v850_v45  ;;  %v833_v20 = vrot.slane %v832_v22, 2  ;;  %v854_v45 = vsub.f32 %v2118_v35, %v2210_v59 }
 0x25d   :  { %v771_v40 = vadd.f32 %v770_v19, %v769_v7  ;;  %v826_v55 = vrot.slane %v825_v46, 1  ;;  %v779_v26 = vrot.slane %v778_v10, 1  ;;  %vm879_vm15 = vweird.f32 %v869_v16 }
 0x25e   :  { %1723 = vrsqrt.f32 %v870_v34  ;;  %v834_v31 = vadd.f32 %v833_v20, %v832_v22  ;;  %v2241_v6 = vpop.permute.xlu2 %962  ;;  %v858_v4 = vsub.f32 %v2120_v38, %v2210_v59  ;;  %v861_v51 = vsub.f32 %v2123_v30, %v2197_v24  ;;  %v2264_v24 = vpop.permute.xlu0 %938 }
 0x25f   :  { %v2221_v18 = vmul.f32 %v771_v40, %v1916_v52  ;;  %v827_v25 = vadd.f32 %v826_v55, %v825_v46  ;;  %v780_v29 = vadd.f32 %v779_v26, %v778_v10  ;;  %v862_v22 = vsub.f32 %v2130_v5, %v2210_v59 }
 0x260   :  { %v835_v21 = vrot.slane %v834_v31, 1  ;;  %vm889_vm3 = vweird.f32 %v870_v34 }
 0x261   :  { %v839_v53 = vmul.f32 %v827_v25, %v1916_v52  ;;  %v843_v56 = vmul.f32 %v2221_v18, %v2221_v18  ;;  %v2229_v9 = vmul.f32 %v780_v29, %v1916_v52  ;;  %v867_v63 = vsub.f32 %v2192_v39, %v2221_v18 }
 0x262   :  { %v1722_v14 = vpop.eup %1721  ;;  %v836_v60 = vadd.f32 %v835_v21, %v834_v31  ;;  %v855_v55 = vsub.f32 %v2162_v49, %v2221_v18  ;;  %v859_v30 = vsub.f32 %v2157_v23, %v2221_v18 }
 0x263   :  { %v874_v54 = vmul.f32 %v1722_v14, %v869_v16  ;;  %v847_v17 = vsub.f32 %v839_v53, %v843_v56  ;;  %v844_v33 = vmul.f32 %v2229_v9, %v2229_v9  ;;  %vm880_vm14 = vweird.f32 %v1722_v14 }
 0x264   :  { %v1724_v27 = vpop.eup %1723  ;;  %v840_v1 = vmul.f32 %v836_v60, %v1916_v52  ;;  %vm881_vm2 = vmor %vm879_vm15, %vm880_vm14 }
 0x265   :  { %v875_v61 = vmul.f32 %v1722_v14, %v874_v54  ;;  %v884_v13 = vmul.f32 %v1724_v27, %v870_v34  ;;  %v851_v8 = vmax.f32 %v847_v17, 0.0  ;;  %vm890_vm1 = vweird.f32 %v1724_v27  ;;  %v2266_v34 = vpop.permute.xlu1 %942 }
 0x266   :  { %v848_v41 = vsub.f32 %v840_v1, %v844_v33  ;;  %vm891_vm4 = vmor %vm889_vm3, %vm890_vm1  ;;  %v2278_v60 = vpop.permute.xlu2 %966 }
 0x267   :  { %v876_v2 = vmul.f32 0.5, %v875_v61  ;;  %v885_v43 = vmul.f32 %v1724_v27, %v884_v13  ;;  %v2234_v0 = vadd.f32 1e-05, %v851_v8 }
 0x268   :  { %v852_v15 = vmax.f32 %v848_v41, 0.0 }
 0x269   :  { %v877_v62 = vsub.f32 1.5, %v876_v2  ;;  %v886_v7 = vmul.f32 0.5, %v885_v43  ;;  %1725 = vrsqrt.f32 %v2234_v0  ;;  %vm899_vm5 = vweird.f32 %v2234_v0 }
 0x26a   :  { %v2249_v46 = vadd.f32 1e-05, %v852_v15 }
 0x26b   :  { %v878_v19 = vmul.f32 %v1722_v14, %v877_v62  ;;  %v887_v44 = vsub.f32 1.5, %v886_v7 }
 0x26c   :  { %1727 = vrsqrt.f32 %v2249_v46  ;;  %vm909_vm9 = vweird.f32 %v2249_v46 }
 0x26d   :  { %v882_v35 = vsel %vm881_vm2, %v1722_v14, %v878_v19  ;;  %v888_v40 = vmul.f32 %v1724_v27, %v887_v44 }
 0x26e   :  { %v925_v16 = vmul.f32 %v882_v35, %v865_v11  ;;  %v913_v38 = vmul.f32 %v882_v35, %v853_v3  ;;  %v917_v5 = vmul.f32 %v882_v35, %v857_v48  ;;  %v921_v59 = vmul.f32 %v882_v35, %v861_v51 }
 0x26f   :  { %v1726_v10 = vpop.eup %1725  ;;  %v892_v20 = vsel %vm891_vm4, %v1724_v27, %v888_v40 }
 0x270   :  { %v926_v39 = vmul.f32 %v892_v20, %v866_v28  ;;  %v894_v25 = vmul.f32 %v1726_v10, %v2234_v0  ;;  %v914_v26 = vmul.f32 %v892_v20, %v854_v45  ;;  %v945_v49 = vmul.f32 %v2215_v12, %v913_v38 }
 0x271   :  { %v918_v31 = vmul.f32 %v892_v20, %v858_v4  ;;  %v949_v53 = vmul.f32 %v2223_v47, %v917_v5  ;;  %v922_v56 = vmul.f32 %v892_v20, %v862_v22  ;;  %v953_v14 = vmul.f32 %v2264_v24, %v921_v59 }
 0x272   :  { %v895_v29 = vmul.f32 %v1726_v10, %v894_v25  ;;  %v946_v23 = vmul.f32 %v2215_v12, %v914_v26  ;;  %v957_v21 = vmul.f32 %v2266_v34, %v925_v16  ;;  %vm900_vm6 = vweird.f32 %v1726_v10  ;;  %v1728_v61 = vpop.eup %1727 }
 0x273   :  { %v950_v54 = vmul.f32 %v2223_v47, %v918_v31  ;;  %v954_v17 = vmul.f32 %v2264_v24, %v922_v56  ;;  %v958_v27 = vmul.f32 %v2266_v34, %v926_v39  ;;  %v977_v8 = vadd.f32 %v2241_v6, %v945_v49  ;;  %vm901_vm7 = vmor %vm899_vm5, %vm900_vm6 }
 0x274   :  { %v896_v13 = vmul.f32 0.5, %v895_v29  ;;  %v985_v1 = vadd.f32 %v2144_v50, %v953_v14  ;;  %v989_v33 = vadd.f32 %v2179_v37, %v957_v21  ;;  %v904_v2 = vmul.f32 %v1728_v61, %v2249_v46 }
 0x275   :  { %v978_v43 = vadd.f32 %v2241_v6, %v946_v23  ;;  %v986_v11 = vadd.f32 %v2144_v50, %v954_v17  ;;  %v990_v41 = vadd.f32 %v2179_v37, %v958_v27  ;;  %v981_v28 = vadd.f32 %v2278_v60, %v949_v53 }
 0x276   :  { %v897_v3 = vsub.f32 1.5, %v896_v13  ;;  %v1001_v62 = vmax.f32 %v985_v1, 0.0  ;;  %v1005_v7 = vmax.f32 %v989_v33, 0.0  ;;  %v905_v15 = vmul.f32 %v1728_v61, %v904_v2 }
 0x277   :  { %v1002_v45 = vmax.f32 %v986_v11, 0.0  ;;  %v1006_v48 = vmax.f32 %v990_v41, 0.0  ;;  %v982_v19 = vadd.f32 %v2278_v60, %v950_v54  ;;  %v993_v51 = vmax.f32 %v977_v8, 0.0 }
 0x278   :  { %v898_v44 = vmul.f32 %v1726_v10, %v897_v3  ;;  %v1018_v4 = vpack.c.bf16 %v1005_v7, %v1001_v62  ;;  %v997_v22 = vmax.f32 %v981_v28, 0.0  ;;  %v906_v35 = vmul.f32 0.5, %v905_v15 }
 0x279   :  { %v1019_v40 = vpack.c.bf16 %v1006_v48, %v1002_v45  ;;  %v994_v16 = vmax.f32 %v978_v43, 0.0  ;;  %v998_v38 = vmax.f32 %v982_v19, 0.0  ;;  %v868_v5 = vsub.f32 %v2203_v42, %v2229_v9  ;;  %v1569_v19 = vld [vmem:[%s2601_s1 + $0x28] sm:$0xff] }
 0x27a   :  { %v902_v20 = vsel %vm901_vm7, %v1726_v10, %v898_v44  ;;  %vm910_vm8 = vweird.f32 %v1728_v61  ;;  %v863_v59 = vsub.f32 %v2167_v58, %v2221_v18  ;;  %1060 = vmatpush.bf16.msra.mxu0 %v1018_v4  ;;  %v907_v25 = vsub.f32 1.5, %v906_v35  ;;  %v1568_v58 = vld [vmem:[%s2601_s1 + $0x20] sm:$0xff]  ;;  %v1740_v44 = vld [vmem:[%s2602_s2 + $0x8] sm:$0xff] }
 0x27b   :  { %v927_v39 = vmul.f32 %v902_v20, %v867_v63  ;;  %v915_v26 = vmul.f32 %v902_v20, %v855_v55  ;;  %v919_v49 = vmul.f32 %v902_v20, %v859_v30  ;;  %1079 = vmatpush.bf16.msra.mxu1 %v1019_v40  ;;  %v1014_v31 = vpack.c.bf16 %v997_v22, %v993_v51  ;;  %vm911_vm10 = vmor %vm909_vm9, %vm910_vm8  ;;  %v1394_v51 = vld [vmem:[%s2602_s2] sm:$0x1] }
 0x27c   :  { %v923_v0 = vmul.f32 %v902_v20, %v863_v59  ;;  %v1015_v53 = vpack.c.bf16 %v998_v38, %v994_v16  ;;  %v908_v56 = vmul.f32 %v1728_v61, %v907_v25  ;;  %v856_v18 = vsub.f32 %v2164_v57, %v2229_v9 }
 0x27d   :  { %v947_v10 = vmul.f32 %v2215_v12, %v915_v26  ;;  %v951_v42 = vmul.f32 %v2223_v47, %v919_v49  ;;  %v959_v29 = vmul.f32 %v2266_v34, %v927_v39  ;;  %v860_v46 = vsub.f32 %v2171_v32, %v2229_v9 }
 0x27e   :  { %v864_v63 = vsub.f32 %v2182_v36, %v2229_v9  ;;  %v955_v55 = vmul.f32 %v2264_v24, %v923_v0  ;;  %1061 = vmatpush.bf16.msra.mxu0 %v1014_v31  ;;  %v912_v30 = vsel %vm911_vm10, %v1728_v61, %v908_v56  ;;  %v1803_v41 = vmov 6  }
 0x27f   :  { %v991_v23 = vadd.f32 %v2179_v37, %v959_v29  ;;  %1080 = vmatpush.bf16.msra.mxu1 %v1015_v53  ;;  %v928_v14 = vmul.f32 %v912_v30, %v868_v5  ;;  %v916_v21 = vmul.f32 %v912_v30, %v856_v18  ;;  %v920_v54 = vmul.f32 %v912_v30, %v860_v46 }
 0x280   :  { %v924_v17 = vmul.f32 %v912_v30, %v864_v63  ;;  %v979_v27 = vadd.f32 %v2241_v6, %v947_v10  ;;  %v987_v57 = vadd.f32 %v2144_v50, %v955_v55  ;;  %v983_v32 = vadd.f32 %v2278_v60, %v951_v42  ;;  %1701 = vset.pattern.permute.xlu2 %v1803_v41 }
 0x281   :  { %v1007_v13 = vmax.f32 %v991_v23, 0.0  ;;  %1556 = vmatmul.msk.bf16.vlgmr.msra.gmra.mxu0 %vm270_vm0, %v1568_v58  ;;  %v948_v36 = vmul.f32 %v2215_v12, %v916_v21  ;;  %v952_v9 = vmul.f32 %v2223_v47, %v920_v54  ;;  %v960_v8 = vmul.f32 %v2266_v34, %v928_v14 }
 0x282   :  { %v956_v61 = vmul.f32 %v2264_v24, %v924_v17  ;;  %1558 = vmatmul.msk.bf16.vlgmr.msra.gmra.mxu1 %vm270_vm0, %v1568_v58  ;;  %v1003_v1 = vmax.f32 %v987_v57, 0.0  ;;  %v995_v3 = vmax.f32 %v979_v27, 0.0  ;;  %v999_v47 = vmax.f32 %v983_v32, 0.0  ;;  %v1737_v24 = vld [vmem:[%s2602_s2] sm:$0xff] }
 0x283   :  { %v980_v33 = vadd.f32 %v2241_v6, %v948_v36  ;;  %v992_v43 = vadd.f32 %v2179_v37, %v960_v8  ;;  %v984_v11 = vadd.f32 %v2278_v60, %v952_v9  ;;  %1023 = vperm.xlu2 %1701, %v1737_v24   ;;  %v1804_v34 = vmov 7   ;;  %v1739_v60 = vld [vmem:[%s2602_s2 + $0x18] sm:$0xff] }
 0x284   :  { %v988_v2 = vadd.f32 %v2144_v50, %v956_v61  ;;  %v1020_v12 = vpack.c.bf16 %v1007_v13, %v1003_v1  ;;  %1703 = vset.pattern.permute.xlu1 %v1804_v34  ;;  %v1738_v50 = vld [vmem:[%s2602_s2 + $0x10] sm:$0xff]  ;;  %v1805_v37 = vmov 8   ;;  %v1016_v45 = vpack.c.bf16 %v999_v47, %v995_v3 }
 0x285   :  { %v1008_v6 = vmax.f32 %v992_v43, 0.0  ;;  %1323 = vperm.xlu1 %1703, %v1738_v50   ;;  %1707 = vset.pattern.permute.xlu0 %v1805_v37  ;;  %v996_v28 = vmax.f32 %v980_v33, 0.0  ;;  %v1000_v15 = vmax.f32 %v984_v11, 0.0  ;;  %v1806_v4 = vmov 9  }
 0x286   :  { %v1004_v62 = vmax.f32 %v988_v2, 0.0  ;;  %1098 = vmatpush.bf16.msra.mxu2 %v1020_v12  ;;  %1359 = vperm.xlu0 %1707, %v1739_v60   ;;  %v1807_v22 = vmov 10   ;;  %vm1479_vm7 = vcmask 1040384   ;;  %vm1481_vm8 = vcmask 1042434  }
 0x287   :  { %v1017_v48 = vpack.c.bf16 %v1000_v15, %v996_v28  ;;  %vm1483_vm9 = vcmask 1041408  }
 0x288   :  { %v1021_v7 = vpack.c.bf16 %v1008_v6, %v1004_v62 }
 0x28a   :  { %1117 = vmatpush.bf16.msra.mxu3 %v1021_v7  ;;  %1099 = vmatpush.bf16.msra.mxu2 %v1016_v45 }
 0x28b   :  { %1027 = vperm.xlu2 %1701, %v1740_v44  }
 0x28d   :  { %1560 = vmatmul.msk.bf16.vlgmr.msra.gmra.mxu2 %vm270_vm0, %v1568_v58  ;;  %1705 = vset.pattern.permute.xlu1 %v1805_v37 }
 0x28e   :  { %1118 = vmatpush.bf16.msra.mxu3 %v1017_v48  ;;  %1351 = vperm.xlu1 %1705, %v1740_v44  }
 0x28f   :  { %1710 = vset.pattern.permute.xlu0 %v1807_v22 }
 0x290   :  { %1465 = vperm.xlu0 %1710, %v1394_v51  }
 0x291   :  { %1562 = vmatmul.msk.bf16.vlgmr.msra.gmra.mxu3 %vm270_vm0, %v1568_v58  ;;  %1557 = vmatmul.msk.bf16.gmra.mxu0 %vm270_vm0, %v1569_v19 }
 0x292   :  { %1559 = vmatmul.msk.bf16.gmra.mxu1 %vm270_vm0, %v1569_v19 }
 0x293   :  { %1031 = vperm.xlu2 %1701, %v1738_v50  }
 0x296   :  { %1355 = vperm.xlu1 %1705, %v1738_v50  }
 0x29b   :  { %1035 = vperm.xlu2 %1701, %v1739_v60  }
 0x29d   :  { %1561 = vmatmul.msk.bf16.gmra.mxu2 %vm270_vm0, %v1569_v19 }
 0x29e   :  { %1709 = vset.pattern.permute.xlu1 %v1806_v4 }
 0x29f   :  { %1400 = vperm.xlu1 %1709, %v1740_v44  }
 0x2a1   :  { %1563 = vmatmul.msk.bf16.gmra.mxu3 %vm270_vm0, %v1569_v19 }
 0x2a3   :  { %1702 = vset.pattern.permute.xlu2 %v1804_v34 }
 0x2a4   :  { %1315 = vperm.xlu2 %1702, %v1737_v24  }
 0x2a7   :  { %1408 = vperm.xlu1 %1709, %v1739_v60  }
 0x2ac   :  { %1319 = vperm.xlu2 %1702, %v1740_v44  }
 0x2b4   :  { %1704 = vset.pattern.permute.xlu2 %v1805_v37 }
 0x2b5   :  { %1347 = vperm.xlu2 %1704, %v1737_v24  }
 0x2bd   :  { %1706 = vset.pattern.permute.xlu2 %v1804_v34 }
 0x2be   :  { %1327 = vperm.xlu2 %1706, %v1739_v60  }
 0x2c6   :  { %1708 = vset.pattern.permute.xlu2 %v1806_v4 }
 0x2c7   :  { %1396 = vperm.xlu2 %1708, %v1737_v24  }
 0x2cf   :  { %1404 = vperm.xlu2 %1708, %v1738_v50  }
 0x2dd   :  { %v2349_v35 = vpop.permute.xlu2 %1023 }
 0x2e5   :  { %v2351_v38 = vpop.permute.xlu2 %1027 }
 0x2ed   :  { %v2353_v59 = vpop.permute.xlu2 %1031 }
 0x2f5   :  { %v2383_v63 = vpop.permute.xlu2 %1035 }
 0x2fe   :  { %v1063_v40 = vpop.f32.mrf.mxu0  ;;  %v2405_v12 = vpop.permute.xlu2 %1315 }
 0x2ff   :  { %v1082_v16 = vpop.f32.mrf.mxu1  ;;  %v2356_v39 = vadd.f32 %v1063_v40, %v2349_v35 }
 0x300   :  { %v2362_v26 = vadd.f32 %v1082_v16, %v2349_v35 }
 0x301   :  { %v1170_v53 = vmul.f32 %v2356_v39, %v2356_v39 }
 0x302   :  { %v1171_v29 = vmul.f32 %v2362_v26, %v2362_v26 }
 0x306   :  { %v1065_v20 = vpop.f32.mrf.mxu0 }
 0x307   :  { %v1084_v5 = vpop.f32.mrf.mxu1  ;;  %v2359_v25 = vadd.f32 %v1065_v20, %v2351_v38 }
 0x308   :  { %v2365_v49 = vadd.f32 %v1084_v5, %v2351_v38 }
 0x309   :  { %v1174_v56 = vmul.f32 %v2359_v25, %v2359_v25  ;;  %v1130_v46 = vadd.f32 %v2359_v25, %v2356_v39 }
 0x30a   :  { %v1175_v58 = vmul.f32 %v2365_v49, %v2365_v49  ;;  %v1139_v55 = vadd.f32 %v2365_v49, %v2362_v26 }
 0x30b   :  { %v1186_v23 = vadd.f32 %v1174_v56, %v1170_v53 }
 0x30c   :  { %v1195_v21 = vadd.f32 %v1175_v58, %v1171_v29  ;;  %v2418_v29 = vpop.permute.xlu2 %1319 }
 0x30e   :  { %v1068_v0 = vpop.f32.mrf.mxu0 }
 0x30f   :  { %v1087_v31 = vpop.f32.mrf.mxu1  ;;  %v2372_v10 = vadd.f32 %v1068_v0, %v2353_v59 }
 0x310   :  { %v1101_v42 = vpop.f32.mrf.mxu2  ;;  %v2379_v18 = vadd.f32 %v1087_v31, %v2353_v59 }
 0x311   :  { %v1178_v14 = vmul.f32 %v2372_v10, %v2372_v10  ;;  %v1131_v27 = vadd.f32 %v1130_v46, %v2372_v10  ;;  %v2411_v51 = vadd.f32 %v1101_v42, %v2349_v35 }
 0x312   :  { %v1179_v54 = vmul.f32 %v2379_v18, %v2379_v18  ;;  %v1140_v32 = vadd.f32 %v1139_v55, %v2379_v18 }
 0x313   :  { %v1187_v9 = vadd.f32 %v1186_v23, %v1178_v14  ;;  %v1172_v55 = vmul.f32 %v2411_v51, %v2411_v51 }
 0x314   :  { %v1120_v30 = vpop.f32.mrf.mxu3  ;;  %v1196_v33 = vadd.f32 %v1195_v21, %v1179_v54  ;;  %v2431_v54 = vpop.permute.xlu1 %1323 }
 0x315   :  { %v2426_v23 = vadd.f32 %v1120_v30, %v2349_v35 }
 0x316   :  { %v1070_v17 = vpop.f32.mrf.mxu0 }
 0x317   :  { %v2393_v57 = vadd.f32 %v1070_v17, %v2383_v63  ;;  %v1089_v13 = vpop.f32.mrf.mxu1 }
 0x318   :  { %v2397_v36 = vadd.f32 %v1089_v13, %v2383_v63  ;;  %v1103_v1 = vpop.f32.mrf.mxu2 }
 0x319   :  { %v1132_v61 = vadd.f32 %v1131_v27, %v2393_v57  ;;  %v1182_v8 = vmul.f32 %v2393_v57, %v2393_v57  ;;  %v2408_v48 = vadd.f32 %v1103_v1, %v2351_v38 }
 0x31a   :  { %v1141_v2 = vadd.f32 %v1140_v32, %v2397_v36  ;;  %v1183_v43 = vmul.f32 %v2397_v36, %v2397_v36 }
 0x31b   :  { %v1133_v11 = vrot.slane %v1132_v61, 4  ;;  %v1188_v41 = vadd.f32 %v1187_v9, %v1182_v8  ;;  %v1176_v56 = vmul.f32 %v2408_v48, %v2408_v48  ;;  %v1148_v30 = vadd.f32 %v2408_v48, %v2411_v51 }
 0x31c   :  { %v1142_v3 = vrot.slane %v1141_v2, 4  ;;  %v1197_v47 = vadd.f32 %v1196_v33, %v1183_v43  ;;  %v1122_v24 = vpop.f32.mrf.mxu3 }
 0x31d   :  { %v1134_v34 = vadd.f32 %v1133_v11, %v1132_v61  ;;  %v1189_v62 = vrot.slane %v1188_v41, 4  ;;  %v2421_v42 = vadd.f32 %v1122_v24, %v2351_v38  ;;  %v1204_v9 = vadd.f32 %v1176_v56, %v1172_v55 }
 0x31e   :  { %v1143_v6 = vadd.f32 %v1142_v3, %v1141_v2  ;;  %v1198_v50 = vrot.slane %v1197_v47, 4  ;;  %v1173_v2 = vmul.f32 %v2426_v23, %v2426_v23 }
 0x31f   :  { %v1135_v37 = vrot.slane %v1134_v34, 2  ;;  %v1190_v60 = vadd.f32 %v1189_v62, %v1188_v41  ;;  %v1157_v33 = vadd.f32 %v2421_v42, %v2426_v23 }
 0x320   :  { %v1144_v7 = vrot.slane %v1143_v6, 2  ;;  %v1199_v28 = vadd.f32 %v1198_v50, %v1197_v47  ;;  %v1106_v19 = vpop.f32.mrf.mxu2 }
 0x321   :  { %v1136_v15 = vadd.f32 %v1135_v37, %v1134_v34  ;;  %v1191_v45 = vrot.slane %v1190_v60, 2  ;;  %v2414_v5 = vadd.f32 %v1106_v19, %v2353_v59 }
 0x322   :  { %v1145_v44 = vadd.f32 %v1144_v7, %v1143_v6  ;;  %v1200_v4 = vrot.slane %v1199_v28, 2 }
 0x323   :  { %v1137_v22 = vrot.slane %v1136_v15, 1  ;;  %v1192_v40 = vadd.f32 %v1191_v45, %v1190_v60  ;;  %v1180_v38 = vmul.f32 %v2414_v5, %v2414_v5  ;;  %v1149_v11 = vadd.f32 %v1148_v30, %v2414_v5 }
 0x324   :  { %v1146_v16 = vrot.slane %v1145_v44, 1  ;;  %v1201_v20 = vadd.f32 %v1200_v4, %v1199_v28  ;;  %v1125_v0 = vpop.f32.mrf.mxu3  ;;  %v2469_v4 = vpop.permute.xlu2 %1347 }
 0x325   :  { %v1138_v31 = vadd.f32 %v1137_v22, %v1136_v15  ;;  %v1193_v53 = vrot.slane %v1192_v40, 1  ;;  %v2439_v13 = vadd.f32 %v1125_v0, %v2353_v59  ;;  %v1177_v59 = vmul.f32 %v2421_v42, %v2421_v42 }
 0x326   :  { %v1147_v58 = vadd.f32 %v1146_v16, %v1145_v44  ;;  %v1202_v46 = vrot.slane %v1201_v20, 1  ;;  %v1205_v47 = vadd.f32 %v1204_v9, %v1180_v38 }
 0x327   :  { %v2429_v14 = vmul.f32 %v1138_v31, %v1916_v52  ;;  %v1194_v21 = vadd.f32 %v1193_v53, %v1192_v40  ;;  %v1158_v24 = vadd.f32 %v1157_v33, %v2439_v13  ;;  %v1181_v34 = vmul.f32 %v2439_v13, %v2439_v13 }
 0x328   :  { %v2434_v17 = vmul.f32 %v1147_v58, %v1916_v52  ;;  %v1203_v27 = vadd.f32 %v1202_v46, %v1201_v20  ;;  %v1108_v61 = vpop.f32.mrf.mxu2  ;;  %v1213_v28 = vadd.f32 %v1177_v59, %v1173_v2 }
 0x329   :  { %v1222_v32 = vmul.f32 %v1194_v21, %v1916_v52  ;;  %v1226_v35 = vmul.f32 %v2429_v14, %v2429_v14  ;;  %v2457_v41 = vadd.f32 %v1108_v61, %v2383_v63 }
 0x32a   :  { %v1223_v8 = vmul.f32 %v1203_v27, %v1916_v52  ;;  %v1227_v1 = vmul.f32 %v2434_v17, %v2434_v17  ;;  %v1214_v40 = vadd.f32 %v1213_v28, %v1181_v34 }
 0x32b   :  { %v1230_v43 = vsub.f32 %v1222_v32, %v1226_v35  ;;  %v1150_v50 = vadd.f32 %v1149_v11, %v2457_v41  ;;  %v1184_v37 = vmul.f32 %v2457_v41, %v2457_v41 }
 0x32c   :  { %v1231_v3 = vsub.f32 %v1223_v8, %v1227_v1  ;;  %v1127_v62 = vpop.f32.mrf.mxu3  ;;  %v2479_v11 = vpop.permute.xlu2 %1327 }
 0x32d   :  { %v1234_v6 = vmax.f32 %v1230_v43, 0.0  ;;  %v2466_v60 = vadd.f32 %v1127_v62, %v2383_v63  ;;  %v1151_v45 = vrot.slane %v1150_v50, 4  ;;  %v1206_v19 = vadd.f32 %v1205_v47, %v1184_v37  ;;  %v2475_v63 = vpop.permute.xlu1 %1351 }
 0x32e   :  { %v1235_v7 = vmax.f32 %v1231_v3, 0.0  ;;  %v1250_v37 = vsub.f32 %v2393_v57, %v2429_v14  ;;  %v1238_v57 = vsub.f32 %v2356_v39, %v2429_v14  ;;  %v1242_v39 = vsub.f32 %v2359_v25, %v2429_v14 }
 0x32f   :  { %v1254_v15 = vadd.f32 1e-05, %v1234_v6  ;;  %v1159_v44 = vadd.f32 %v1158_v24, %v2466_v60  ;;  %v1185_v16 = vmul.f32 %v2466_v60, %v2466_v60  ;;  %v1152_v20 = vadd.f32 %v1151_v45, %v1150_v50 }
 0x330   :  { %v2471_v22 = vadd.f32 1e-05, %v1235_v7  ;;  %v1207_v0 = vrot.slane %v1206_v19, 4 }
 0x331   :  { %1729 = vrsqrt.f32 %v1254_v15  ;;  %v1160_v31 = vrot.slane %v1159_v44, 4  ;;  %v1215_v53 = vadd.f32 %v1214_v40, %v1185_v16  ;;  %v1153_v56 = vrot.slane %v1152_v20, 2 }
 0x332   :  { %1731 = vrsqrt.f32 %v2471_v22  ;;  %v1208_v58 = vadd.f32 %v1207_v0, %v1206_v19  ;;  %v1251_v19 = vsub.f32 %v2397_v36, %v2434_v17  ;;  %vm1264_vm12 = vweird.f32 %v1254_v15 }
 0x333   :  { %v1161_v46 = vadd.f32 %v1160_v31, %v1159_v44  ;;  %v1216_v55 = vrot.slane %v1215_v53, 4  ;;  %v1154_v21 = vadd.f32 %v1153_v56, %v1152_v20  ;;  %vm1274_vm14 = vweird.f32 %v2471_v22 }
 0x334   :  { %v1209_v27 = vrot.slane %v1208_v58, 2 }
 0x335   :  { %v1162_v38 = vrot.slane %v1161_v46, 2  ;;  %v1217_v32 = vadd.f32 %v1216_v55, %v1215_v53  ;;  %v1155_v30 = vrot.slane %v1154_v21, 1  ;;  %v2484_v50 = vpop.permute.xlu1 %1355 }
 0x336   :  { %v1210_v9 = vadd.f32 %v1209_v27, %v1208_v58 }
 0x337   :  { %v1730_v35 = vpop.eup %1729  ;;  %v1163_v1 = vadd.f32 %v1162_v38, %v1161_v46  ;;  %v1218_v33 = vrot.slane %v1217_v32, 2  ;;  %v1156_v2 = vadd.f32 %v1155_v30, %v1154_v21  ;;  %v1239_v21 = vsub.f32 %v2362_v26, %v2434_v17 }
 0x338   :  { %v1732_v61 = vpop.eup %1731  ;;  %v1259_v8 = vmul.f32 %v1730_v35, %v1254_v15  ;;  %v1211_v43 = vrot.slane %v1210_v9, 1  ;;  %vm1265_vm0 = vweird.f32 %v1730_v35 }
 0x339   :  { %v1269_v59 = vmul.f32 %v1732_v61, %v2471_v22  ;;  %v1164_v47 = vrot.slane %v1163_v1, 1  ;;  %v1219_v24 = vadd.f32 %v1218_v33, %v1217_v32  ;;  %v2482_v62 = vmul.f32 %v1156_v2, %v1916_v52  ;;  %vm1266_vm13 = vmor %vm1264_vm12, %vm1265_vm0 }
 0x33a   :  { %v1260_v3 = vmul.f32 %v1730_v35, %v1259_v8  ;;  %v1212_v6 = vadd.f32 %v1211_v43, %v1210_v9  ;;  %vm1275_vm11 = vweird.f32 %v1732_v61  ;;  %v1246_v22 = vsub.f32 %v2372_v10, %v2429_v14  ;;  %v2512_v8 = vpop.permute.xlu2 %1396 }
 0x33b   :  { %v1270_v34 = vmul.f32 %v1732_v61, %v1269_v59  ;;  %v1165_v28 = vadd.f32 %v1164_v47, %v1163_v1  ;;  %v1220_v45 = vrot.slane %v1219_v24, 1  ;;  %v1228_v16 = vmul.f32 %v2482_v62, %v2482_v62  ;;  %vm1276_vm15 = vmor %vm1274_vm14, %vm1275_vm11 }
 0x33c   :  { %v1261_v7 = vmul.f32 0.5, %v1260_v3  ;;  %v1224_v40 = vmul.f32 %v1212_v6, %v1916_v52  ;;  %v1247_v33 = vsub.f32 %v2379_v18, %v2434_v17 }
 0x33d   :  { %v1271_v44 = vmul.f32 0.5, %v1270_v34  ;;  %v2494_v0 = vmul.f32 %v1165_v28, %v1916_v52  ;;  %v1221_v31 = vadd.f32 %v1220_v45, %v1219_v24  ;;  %v2532_v45 = vpop.permute.xlu0 %1359 }
 0x33e   :  { %v1262_v20 = vsub.f32 1.5, %v1261_v7  ;;  %v1232_v56 = vsub.f32 %v1224_v40, %v1228_v16 }
 0x33f   :  { %v1272_v53 = vsub.f32 1.5, %v1271_v44  ;;  %v1225_v36 = vmul.f32 %v1221_v31, %v1916_v52  ;;  %v1229_v46 = vmul.f32 %v2494_v0, %v2494_v0  ;;  %v1243_v52 = vsub.f32 %v2365_v49, %v2434_v17 }
 0x340   :  { %v1263_v58 = vmul.f32 %v1730_v35, %v1262_v20  ;;  %v1236_v27 = vmax.f32 %v1232_v56, 0.0 }
 0x341   :  { %v1273_v55 = vmul.f32 %v1732_v61, %v1272_v53  ;;  %v1233_v32 = vsub.f32 %v1225_v36, %v1229_v46 }
 0x342   :  { %v1267_v38 = vsel %vm1266_vm13, %v1730_v35, %v1263_v58  ;;  %v2508_v9 = vadd.f32 1e-05, %v1236_v27 }
 0x343   :  { %v1277_v15 = vsel %vm1276_vm15, %v1732_v61, %v1273_v55  ;;  %v1298_v30 = vmul.f32 %v1267_v38, %v1238_v57  ;;  %v1237_v1 = vmax.f32 %v1233_v32, 0.0  ;;  %v1302_v35 = vmul.f32 %v1267_v38, %v1242_v39  ;;  %v2518_v61 = vpop.permute.xlu1 %1400  ;;  %v2542_v55 = vpop.permute.xlu2 %1404 }
 0x344   :  { %v1299_v26 = vmul.f32 %v1277_v15, %v1239_v21  ;;  %v1311_v59 = vmul.f32 %v1277_v15, %v1251_v19  ;;  %1733 = vrsqrt.f32 %v2508_v9  ;;  %v1303_v49 = vmul.f32 %v1277_v15, %v1243_v52 }
 0x345   :  { %v1330_v25 = vmul.f32 %v2405_v12, %v1298_v30  ;;  %v2521_v43 = vadd.f32 1e-05, %v1237_v1  ;;  %v1334_v10 = vmul.f32 %v2418_v29, %v1302_v35  ;;  %v1306_v14 = vmul.f32 %v1267_v38, %v1246_v22 }
 0x346   :  { %v1331_v2 = vmul.f32 %v2405_v12, %v1299_v26  ;;  %v1310_v3 = vmul.f32 %v1267_v38, %v1250_v37  ;;  %v1335_v47 = vmul.f32 %v2418_v29, %v1303_v49  ;;  %v1307_v24 = vmul.f32 %v1277_v15, %v1247_v33 }
 0x347   :  { %v1362_v18 = vadd.f32 %v2469_v4, %v1330_v25  ;;  %1735 = vrsqrt.f32 %v2521_v43  ;;  %v1338_v17 = vmul.f32 %v2431_v54, %v1306_v14  ;;  %v1366_v7 = vadd.f32 %v2475_v63, %v1334_v10 }
 0x348   :  { %v1363_v34 = vadd.f32 %v2469_v4, %v1331_v2  ;;  %v1339_v6 = vmul.f32 %v2431_v54, %v1307_v24  ;;  %v1367_v28 = vadd.f32 %v2475_v63, %v1335_v47  ;;  %v1343_v44 = vmul.f32 %v2479_v11, %v1311_v59 }
 0x349   :  { %v1378_v37 = vmax.f32 %v1362_v18, 0.0  ;;  %v1382_v16 = vmax.f32 %v1366_v7, 0.0  ;;  %v1342_v31 = vmul.f32 %v2479_v11, %v1310_v3  ;;  %v1370_v56 = vadd.f32 %v2484_v50, %v1338_v17 }
 0x34a   :  { %v1379_v19 = vmax.f32 %v1363_v34, 0.0  ;;  %v1734_v40 = vpop.eup %1733  ;;  %v1383_v20 = vmax.f32 %v1367_v28, 0.0  ;;  %v1371_v53 = vadd.f32 %v2484_v50, %v1339_v6  ;;  %v1375_v36 = vadd.f32 %v2532_v45, %v1343_v44 }
 0x34b   :  { %v1279_v57 = vmul.f32 %v1734_v40, %v2508_v9  ;;  %v1411_v32 = vmul.f32 %v2512_v8, %v1378_v37  ;;  %v1415_v39 = vmul.f32 %v2518_v61, %v1382_v16  ;;  %v1374_v30 = vadd.f32 %v2532_v45, %v1342_v31  ;;  %v2548_v22 = vpop.permute.xlu1 %1408 }
 0x34c   :  { %v1412_v58 = vmul.f32 %v2512_v8, %v1379_v19  ;;  %v1416_v46 = vmul.f32 %v2518_v61, %v1383_v20  ;;  %v1387_v21 = vmax.f32 %v1371_v53, 0.0  ;;  %v1391_v52 = vmax.f32 %v1375_v36, 0.0 }
 0x34d   :  { %v1736_v27 = vpop.eup %1735  ;;  %v1280_v38 = vmul.f32 %v1734_v40, %v1279_v57  ;;  %v1386_v1 = vmax.f32 %v1370_v56, 0.0  ;;  %v1252_v59 = vsub.f32 %v2457_v41, %v2482_v62  ;;  %vm1285_vm1 = vweird.f32 %v1734_v40 }
 0x34e   :  { %v1289_v15 = vmul.f32 %v1736_v27, %v2521_v43  ;;  %v1420_v35 = vmul.f32 %v2542_v55, %v1387_v21  ;;  %v1436_v33 = vadd.f32 %v1416_v46, %v1412_v58  ;;  %v1244_v49 = vsub.f32 %v2408_v48, %v2482_v62 }
 0x34f   :  { %v1281_v26 = vmul.f32 0.5, %v1280_v38  ;;  %v1427_v10 = vadd.f32 %v1415_v39, %v1411_v32  ;;  %v1424_v3 = vmul.f32 %v2548_v22, %v1391_v52  ;;  %vm1284_vm2 = vweird.f32 %v2508_v9 }
 0x350   :  { %v1290_v25 = vmul.f32 %v1736_v27, %v1289_v15  ;;  %v1437_v14 = vadd.f32 %v1436_v33, %v1420_v35  ;;  %v1248_v24 = vsub.f32 %v2414_v5, %v2482_v62  ;;  %v1240_v18 = vsub.f32 %v2411_v51, %v2482_v62  ;;  %vm1286_vm3 = vmor %vm1284_vm2, %vm1285_vm1 }
 0x351   :  { %v1282_v2 = vsub.f32 1.5, %v1281_v26  ;;  %v1419_v17 = vmul.f32 %v2542_v55, %v1386_v1  ;;  %v1390_v34 = vmax.f32 %v1374_v30, 0.0  ;;  %v1253_v48 = vsub.f32 %v2466_v60, %v2494_v0 }
 0x352   :  { %v1291_v47 = vmul.f32 0.5, %v1290_v25  ;;  %v1438_v6 = vadd.f32 %v1437_v14, %v1424_v3  ;;  %vm1295_vm4 = vweird.f32 %v1736_v27  ;;  %v1245_v9 = vsub.f32 %v2421_v42, %v2494_v0 }
 0x353   :  { %v1283_v41 = vmul.f32 %v1734_v40, %v1282_v2  ;;  %vm1294_vm5 = vweird.f32 %v2521_v43  ;;  %v1249_v51 = vsub.f32 %v2439_v13, %v2494_v0  ;;  %v1428_v5 = vadd.f32 %v1427_v10, %v1419_v17 }
 0x354   :  { %v1292_v7 = vsub.f32 1.5, %v1291_v47  ;;  %vm1296_vm6 = vmor %vm1294_vm5, %vm1295_vm4  ;;  %v1241_v60 = vsub.f32 %v2426_v23, %v2494_v0  ;;  %v1423_v20 = vmul.f32 %v2548_v22, %v1390_v34  ;;  %v1439_v31 = vrot.slane %v1438_v6, 4 }
 0x355   :  { %v1287_v28 = vsel %vm1286_vm3, %v1734_v40, %v1283_v41 }
 0x356   :  { %v1312_v62 = vmul.f32 %v1287_v28, %v1252_v59  ;;  %v1293_v37 = vmul.f32 %v1736_v27, %v1292_v7  ;;  %v1304_v19 = vmul.f32 %v1287_v28, %v1244_v49  ;;  %v1308_v44 = vmul.f32 %v1287_v28, %v1248_v24 }
 0x357   :  { %v1300_v16 = vmul.f32 %v1287_v28, %v1240_v18  ;;  %v1429_v0 = vadd.f32 %v1428_v5, %v1423_v20  ;;  %v1440_v30 = vadd.f32 %v1439_v31, %v1438_v6 }
 0x358   :  { %v1297_v42 = vsel %vm1296_vm6, %v1736_v27, %v1293_v37  ;;  %v1336_v40 = vmul.f32 %v2418_v29, %v1304_v19  ;;  %v1340_v43 = vmul.f32 %v2431_v54, %v1308_v44  ;;  %v1344_v13 = vmul.f32 %v2479_v11, %v1312_v62 }
 0x359   :  { %v1313_v53 = vmul.f32 %v1297_v42, %v1253_v48  ;;  %v1305_v57 = vmul.f32 %v1297_v42, %v1245_v9  ;;  %v1309_v56 = vmul.f32 %v1297_v42, %v1249_v51  ;;  %v1301_v58 = vmul.f32 %v1297_v42, %v1241_v60  ;;  %v1466_v60 = vpop.permute.xlu0 %1465 }
 0x35a   :  { %v1332_v36 = vmul.f32 %v2405_v12, %v1300_v16  ;;  %v1368_v46 = vadd.f32 %v2475_v63, %v1336_v40  ;;  %v1372_v23 = vadd.f32 %v2484_v50, %v1340_v43  ;;  %v1376_v15 = vadd.f32 %v2532_v45, %v1344_v13 }
 0x35b   :  { %v1337_v21 = vmul.f32 %v2418_v29, %v1305_v57  ;;  %v1341_v27 = vmul.f32 %v2431_v54, %v1309_v56  ;;  %v1333_v38 = vmul.f32 %v2405_v12, %v1301_v58  ;;  %v1345_v32 = vmul.f32 %v2479_v11, %v1313_v53 }
 0x35c   :  { %v1364_v39 = vadd.f32 %v2469_v4, %v1332_v36  ;;  %v1384_v52 = vmax.f32 %v1368_v46, 0.0  ;;  %v1388_v12 = vmax.f32 %v1372_v23, 0.0  ;;  %v1430_v49 = vrot.slane %v1429_v0, 4 }
 0x35d   :  { %v1365_v26 = vadd.f32 %v2469_v4, %v1333_v38  ;;  %v1369_v1 = vadd.f32 %v2475_v63, %v1337_v21  ;;  %v1373_v35 = vadd.f32 %v2484_v50, %v1341_v27  ;;  %v1377_v29 = vadd.f32 %v2532_v45, %v1345_v32 }
 0x35e   :  { %v1380_v33 = vmax.f32 %v1364_v39, 0.0  ;;  %v1417_v54 = vmul.f32 %v2518_v61, %v1384_v52  ;;  %v1392_v10 = vmax.f32 %v1376_v15, 0.0  ;;  %v1441_v3 = vrot.slane %v1440_v30, 2 }
 0x35f   :  { %v1381_v59 = vmax.f32 %v1365_v26, 0.0  ;;  %v1385_v11 = vmax.f32 %v1369_v1, 0.0  ;;  %v1389_v25 = vmax.f32 %v1373_v35, 0.0  ;;  %v1393_v63 = vmax.f32 %v1377_v29, 0.0 }
 0x360   :  { %v1413_v2 = vmul.f32 %v2512_v8, %v1380_v33  ;;  %v1421_v50 = vmul.f32 %v2542_v55, %v1388_v12  ;;  %v1431_v18 = vadd.f32 %v1430_v49, %v1429_v0  ;;  %v1425_v17 = vmul.f32 %v2548_v22, %v1392_v10 }
 0x361   :  { %v1414_v14 = vmul.f32 %v2512_v8, %v1381_v59  ;;  %v1418_v4 = vmul.f32 %v2518_v61, %v1385_v11  ;;  %v1422_v47 = vmul.f32 %v2542_v55, %v1389_v25  ;;  %v1426_v6 = vmul.f32 %v2548_v22, %v1393_v63 }
 0x362   :  { %v1445_v45 = vadd.f32 %v1417_v54, %v1413_v2  ;;  %v1442_v48 = vadd.f32 %v1441_v3, %v1440_v30  ;;  %v1432_v9 = vrot.slane %v1431_v18, 2  ;;  %v1486_v57 = vlaneseq }
 0x363   :  { %v1454_v24 = vadd.f32 %v1418_v4, %v1414_v14 }
 0x364   :  { %v1446_v41 = vadd.f32 %v1445_v45, %v1421_v50  ;;  %v1443_v51 = vrot.slane %v1442_v48, 1  ;;  %v1433_v37 = vadd.f32 %v1432_v9, %v1431_v18  ;;  %vm1488_vm10 = vcmp.lt.s32.totalorder %v1486_v57, 512 }
 0x365   :  { %v1455_v34 = vadd.f32 %v1454_v24, %v1422_v47 }
 0x366   :  { %v1447_v7 = vadd.f32 %v1446_v41, %v1425_v17  ;;  %v1444_v55 = vadd.f32 %v1443_v51, %v1442_v48  ;;  %v1434_v20 = vrot.slane %v1433_v37, 1 }
 0x367   :  { %v1456_v8 = vadd.f32 %v1455_v34, %v1426_v6 }
 0x368   :  { %v1448_v61 = vrot.slane %v1447_v7, 4  ;;  %v1469_v22 = vadd.f32 %v1466_v60, %v1444_v55  ;;  %v1435_v13 = vadd.f32 %v1434_v20, %v1433_v37 }
 0x369   :  { %v1457_v28 = vrot.slane %v1456_v8, 4 }
 0x36a   :  { %v1449_v5 = vadd.f32 %v1448_v61, %v1447_v7  ;;  %v1476_v36 = vrot.slane %v1469_v22, 7  ;;  %v1468_v23 = vadd.f32 %v1466_v60, %v1435_v13 }
 0x36b   :  { %v1458_v62 = vadd.f32 %v1457_v28, %v1456_v8 }
 0x36c   :  { %v1450_v19 = vrot.slane %v1449_v5, 2  ;;  %v1480_v21 = vsel %vm1479_vm7, %v1468_v23, %v1476_v36 }
 0x36d   :  { %v1459_v44 = vrot.slane %v1458_v62, 2 }
 0x36e   :  { %v1451_v16 = vadd.f32 %v1450_v19, %v1449_v5 }
 0x36f   :  { %v1460_v31 = vadd.f32 %v1459_v44, %v1458_v62 }
 0x370   :  { %v1452_v42 = vrot.slane %v1451_v16, 1 }
 0x371   :  { %v1461_v40 = vrot.slane %v1460_v31, 1 }
 0x372   :  { %v1453_v43 = vadd.f32 %v1452_v42, %v1451_v16 }
 0x373   :  { %v1462_v53 = vadd.f32 %v1461_v40, %v1460_v31 }
 0x374   :  { %v1470_v56 = vadd.f32 %v1466_v60, %v1453_v43 }
 0x375   :  { %v1471_v58 = vadd.f32 %v1466_v60, %v1462_v53 }
 0x376   :  { %v1477_v46 = vrot.slane %v1470_v56, 6 }
 0x377   :  { %v1478_v0 = vrot.slane %v1471_v58, 5 }
 0x379   :  { %v1482_v27 = vsel %vm1481_vm8, %v1477_v46, %v1478_v0 }
 0x37a   :  { %v1484_v38 = vsel %vm1483_vm9, %v1480_v21, %v1482_v27 }
 0x37b   :  { %1490 = vst.msk [vmem:[#allocation5] sm:$0xf] %vm1488_vm10, %v1484_v38 }
 0x37c   :  { %1494 = vsyncadd [#allocation4], 48  ;;  %s1498_s20 = sshll.u32 %s2603_s3, 4  ;;  %s1808_s21 = smov [#allocation5]   ;;  %s1499_s20 = int_to_ptr.hbm [resolvable:$true] %s1498_s20 }
 0x37d   :  { %s1496_s22 = sshll.u32 %s1808_s21, 4  ;;  %s1497_s22 = int_to_ptr.vmem [resolvable:$true] %s1496_s22 }
 0x37e   :  { %1501 = dma.vmem_to_hbm [thread:$0]  %s1497_s22, 16, %s1499_s20, [#allocation4]  }
 0x37f   :  { %1791 = dma.done.wait [#allocation4], 64  }
 0x380   :  { %1792 = vsyncadd [#allocation4], 4294967232 }
 0x381   :  { %1506 = vsyncpa [#allocation3], 1 }
 0x382   :  { %1507 = vsyncpa [#allocation4], 1 }

</bundles_post_ra>
